<compile_context>
chip_gen: v6e
topology: v6e:2x2x1
jax: 0.10.0
libtpu: 0.0.40
codegen_flags: <defaults>
</compile_context>

<pallas_src>
import jax
import jax.numpy as jnp
from jax.experimental import pallas as pl
from jax.experimental.pallas import tpu as pltpu

# ----------------------------- model hyper-params -----------------------------
EMBED_SIZE = 100      # matches module: embed_size = 100
CONV_OUT   = 128      # Conv1d out_channels
KERNEL     = 5        # Conv1d kernel_size
NUM_CLS    = 2        # num_classes


# ------------------------------- Pallas kernel --------------------------------
def textcnn_conv_pool_kernel(x_ref, wconv_ref, bconv_ref, o_ref):
    """Fused Conv1d('valid', k=K) -> ReLU -> global max pool for one batch tile.

    x_ref     : (BT, L, E_pad)  bf16 embedded tokens (channels-last)
    wconv_ref : (K, E_pad, C)   bf16 conv weights, tap-major
    bconv_ref : (1, C)          f32  conv bias
    o_ref     : (BT, C)         f32  pooled features (lane-dense, C = 128)
    """
    BT, L, E = x_ref.shape
    K, _, C = wconv_ref.shape
    out_len = L - K + 1  # 'valid' conv, matches nn.Conv1d default (no padding)

    # One clean (BT*L, E) x (E, C) MXU matmul per tap (no unaligned input
    # slicing before the matmul); taps are combined by shifted adds on the
    # f32 conv output.  Extra (K-1) rows of matmul per sample are negligible.
    x2 = x_ref[...].reshape(BT * L, E)
    acc = jnp.zeros((BT, out_len, C), dtype=jnp.float32)
    for k in range(K):  # static, unrolled taps
        z = jnp.dot(x2, wconv_ref[k], preferred_element_type=jnp.float32)
        z = z.reshape(BT, L, C)
        acc = acc + z[:, k:k + out_len, :]

    acc = acc + bconv_ref[...].reshape(1, 1, C)   # bias, broadcast over (BT, T)
    acc = jnp.maximum(acc, 0.0)                   # ReLU (f32 on the VPU)

    # AdaptiveMaxPool1d(1) == global max over the (valid) time axis.
    o_ref[...] = jnp.max(acc, axis=1)             # (BT, C) f32, 128-lane store


# --------------------------------- wrapper ------------------------------------
def _choose_bt(B, L):
    """Pick the per-step batch tile.

    Target M = BT*L >= ~512 MXU rows (>=256 fills the 256x256 MXU on v6e/v7x,
    >=128 on v5e), rounded to a multiple of 8 so the pooled (BT, C) output
    block is sublane-aligned, capped by a ~4 MiB per-buffer VMEM budget
    (double-buffered => ~8 MiB; safe under v7x's smaller VMEM).
    """
    bt = pl.cdiv(512, L)
    bt = pl.cdiv(bt, 8) * 8
    vmem_cap = max(8, (4 * 1024 * 1024) // (L * 128 * 2))   # bf16 x-tile bytes
    vmem_cap = max(8, (vmem_cap // 8) * 8)
    bt = min(bt, vmem_cap)
    bt = min(bt, pl.cdiv(B, 8) * 8)
    return max(bt, 8)


def textcnn_forward(tokens, emb_table, w_conv, b_conv, w_fc, b_fc):
    """tokens: (B, L) int32 token ids.  Returns (B, NUM_CLS) float32 logits."""
    B, L = tokens.shape
    V, E = emb_table.shape
    K, _, C = w_conv.shape
    NC = w_fc.shape[1]

    # Pad the embedding (contraction) dim to a multiple of 128 lanes; padded
    # columns are zero in both x and w_conv so the contraction is unchanged.
    E_pad = pl.cdiv(E, 128) * 128
    emb_p = jnp.pad(emb_table, ((0, 0), (0, E_pad - E))).astype(jnp.bfloat16)
    w_conv_p = jnp.pad(w_conv, ((0, 0), (0, E_pad - E), (0, 0))).astype(jnp.bfloat16)

    # Embedding lookup (gather) stays in plain JAX glue; padding_idx=0 row is
    # zeroed at init time, matching nn.Embedding(padding_idx=0).
    # TODO(synk): fuse the gather into the kernel (scalar-prefetched tokens in
    # SMEM + manual DMA from emb_table in pl.ANY) to skip the x_emb HBM round trip.
    x_emb = jnp.take(emb_p, tokens, axis=0)       # (B, L, E_pad) bf16

    # Batch tiling: BT samples per grid step; pad the batch to a multiple of BT
    # (padded rows are zero embeddings and are sliced off after the kernel).
    BT = _choose_bt(B, L)
    B_pad = pl.cdiv(B, BT) * BT
    if B_pad != B:
        x_emb = jnp.pad(x_emb, ((0, B_pad - B), (0, 0), (0, 0)))

    pooled = pl.pallas_call(
        textcnn_conv_pool_kernel,
        out_shape=jax.ShapeDtypeStruct((B_pad, C), jnp.float32),
        grid_spec=pltpu.PrefetchScalarGridSpec(
            num_scalar_prefetch=0,
            grid=(B_pad // BT,),
            in_specs=[
                pl.BlockSpec((BT, L, E_pad), lambda b: (b, 0, 0)),   # activations
                pl.BlockSpec((K, E_pad, C),  lambda b: (0, 0, 0)),   # conv weight
                pl.BlockSpec((1, C),         lambda b: (0, 0)),      # conv bias
            ],
            out_specs=pl.BlockSpec((BT, C), lambda b: (b, 0)),       # pooled feats
        ),
        compiler_params=pltpu.CompilerParams(
            dimension_semantics=("parallel",),
        ),
    )(x_emb, w_conv_p, b_conv.reshape(1, C).astype(jnp.float32))

    pooled = pooled[:B]                            # drop batch padding
    # Final linear layer: (B, 128) x (128, 2) + bias — tiny, done in the wrapper
    # so the kernel's store path stays lane-dense.
    return pooled @ w_fc + b_fc[None, :]


# ------------------------------ reference (JAX) --------------------------------
def textcnn_reference(tokens, emb_table, w_conv, b_conv, w_fc, b_fc):
    # Mirrors the kernel's numerics: bf16 matmul operands, f32 accumulation.
    x = jnp.take(emb_table, tokens, axis=0).astype(jnp.bfloat16)   # (B, L, E)
    w = w_conv.astype(jnp.bfloat16)
    K = w_conv.shape[0]
    L = x.shape[1]
    out_len = L - K + 1
    conv = sum(
        jnp.einsum("ble,ec->blc", x[:, k:k + out_len, :], w[k],
                   preferred_element_type=jnp.float32)
        for k in range(K)
    ) + b_conv[None, None, :]
    conv = jnp.maximum(conv, 0.0)
    pooled = jnp.max(conv, axis=1)                 # (B, C)
    return pooled @ w_fc + b_fc[None, :]


# ----------------------------------- main --------------------------------------
if __name__ == "__main__":
    key = jax.random.PRNGKey(0)
    k_emb, k_wc, k_bc, k_wf, k_bf, k_tok = jax.random.split(key, 6)

    VOCAB = 64   # small synthetic vocab
    B, L = 8, 32

    # Deterministic synthetic parameters (shapes follow the module's __init__).
    emb_table = jax.random.normal(k_emb, (VOCAB, EMBED_SIZE), jnp.float32) * 0.1
    emb_table = emb_table.at[0].set(0.0)  # padding_idx=0 row zeroed

    # Conv1d weight: PyTorch stores (C_out, C_in, K); we store (K, C_in, C_out).
    w_conv = jax.random.normal(k_wc, (KERNEL, EMBED_SIZE, CONV_OUT), jnp.float32) * 0.05
    b_conv = jax.random.normal(k_bc, (CONV_OUT,), jnp.float32) * 0.05

    # Linear weight: PyTorch stores (NC, C); we store transposed (C, NC).
    w_fc = jax.random.normal(k_wf, (CONV_OUT, NUM_CLS), jnp.float32) * 0.05
    b_fc = jax.random.normal(k_bf, (NUM_CLS,), jnp.float32) * 0.05

    tokens = jax.random.randint(k_tok, (B, L), 0, VOCAB, dtype=jnp.int32)

    out = textcnn_forward(tokens, emb_table, w_conv, b_conv, w_fc, b_fc)
    out = jax.block_until_ready(out)

    ref = textcnn_reference(tokens, emb_table, w_conv, b_conv, w_fc, b_fc)
    assert out.shape == (B, NUM_CLS)
    assert jnp.allclose(out, ref, atol=1e-3, rtol=1e-3), (out, ref)

    print("KERNEL_OK")
</pallas_src>

<mosaic_0001>
module attributes {stable_mosaic.version = 11 : i64} {
  func.func @textcnn_conv_pool_kernel(%arg0: i32, %arg1: memref<8x32x128xbf16, #tpu.memory_space<vmem>>, %arg2: memref<5x128x128xbf16, #tpu.memory_space<vmem>>, %arg3: memref<1x128xf32, #tpu.memory_space<vmem>>, %arg4: memref<8x128xf32, #tpu.memory_space<vmem>>) attributes {dimension_semantics = [#tpu.dimension_semantics<parallel>], iteration_bounds = array<i64: 1>, scalar_prefetch = 0 : i64, scratch_operands = 0 : i64, tpu.core_type = #tpu.core_type<tc>, window_params = [{transform_indices = @transform_0, window_bounds = array<i64: 8, 32, 128>}, {pipeline_mode = #tpu.pipeline_mode<synchronous>, transform_indices = @transform_1, window_bounds = array<i64: 5, 128, 128>}, {pipeline_mode = #tpu.pipeline_mode<synchronous>, transform_indices = @transform_2, window_bounds = array<i64: 1, 128>}, {transform_indices = @transform_3, window_bounds = array<i64: 8, 128>}]} {
    %c0 = arith.constant 0 : index
    %c0_0 = arith.constant 0 : index
    %c0_1 = arith.constant 0 : index
    %0 = vector.load %arg1[%c0, %c0_0, %c0_1] : memref<8x32x128xbf16, #tpu.memory_space<vmem>>, vector<8x32x128xbf16>
    %1 = vector.shape_cast %0 : vector<8x32x128xbf16> to vector<256x128xbf16>
    %cst = arith.constant 0.000000e+00 : f32
    %2 = vector.broadcast %cst : f32 to vector<8x28x128xf32>
    %c0_2 = arith.constant 0 : index
    %c0_3 = arith.constant 0 : index
    %c0_4 = arith.constant 0 : index
    %3 = vector.load %arg2[%c0_2, %c0_3, %c0_4] : memref<5x128x128xbf16, #tpu.memory_space<vmem>>, vector<1x128x128xbf16>
    %4 = vector.shape_cast %3 : vector<1x128x128xbf16> to vector<128x128xbf16>
    %cst_5 = arith.constant dense<0.000000e+00> : vector<256x128xf32>
    %5 = tpu.matmul %1, %4, %cst_5 {dimension_numbers = #tpu.dot_dimension_numbers<[1], [0], [0], [1], [0, 0, 1, 1], [], []>} : vector<256x128xbf16>, vector<128x128xbf16>, vector<256x128xf32> -> vector<256x128xf32>
    %6 = vector.shape_cast %5 : vector<256x128xf32> to vector<8x32x128xf32>
    %7 = vector.extract_strided_slice %6 {offsets = [0, 0, 0], sizes = [8, 28, 128], strides = [1, 1, 1]} : vector<8x32x128xf32> to vector<8x28x128xf32>
    %8 = arith.addf %2, %7 : vector<8x28x128xf32>
    %c1 = arith.constant 1 : index
    %c0_6 = arith.constant 0 : index
    %c0_7 = arith.constant 0 : index
    %9 = vector.load %arg2[%c1, %c0_6, %c0_7] : memref<5x128x128xbf16, #tpu.memory_space<vmem>>, vector<1x128x128xbf16>
    %10 = vector.shape_cast %9 : vector<1x128x128xbf16> to vector<128x128xbf16>
    %cst_8 = arith.constant dense<0.000000e+00> : vector<256x128xf32>
    %11 = tpu.matmul %1, %10, %cst_8 {dimension_numbers = #tpu.dot_dimension_numbers<[1], [0], [0], [1], [0, 0, 1, 1], [], []>} : vector<256x128xbf16>, vector<128x128xbf16>, vector<256x128xf32> -> vector<256x128xf32>
    %12 = vector.shape_cast %11 : vector<256x128xf32> to vector<8x32x128xf32>
    %13 = vector.extract_strided_slice %12 {offsets = [0, 1, 0], sizes = [8, 28, 128], strides = [1, 1, 1]} : vector<8x32x128xf32> to vector<8x28x128xf32>
    %14 = arith.addf %8, %13 : vector<8x28x128xf32>
    %c2 = arith.constant 2 : index
    %c0_9 = arith.constant 0 : index
    %c0_10 = arith.constant 0 : index
    %15 = vector.load %arg2[%c2, %c0_9, %c0_10] : memref<5x128x128xbf16, #tpu.memory_space<vmem>>, vector<1x128x128xbf16>
    %16 = vector.shape_cast %15 : vector<1x128x128xbf16> to vector<128x128xbf16>
    %cst_11 = arith.constant dense<0.000000e+00> : vector<256x128xf32>
    %17 = tpu.matmul %1, %16, %cst_11 {dimension_numbers = #tpu.dot_dimension_numbers<[1], [0], [0], [1], [0, 0, 1, 1], [], []>} : vector<256x128xbf16>, vector<128x128xbf16>, vector<256x128xf32> -> vector<256x128xf32>
    %18 = vector.shape_cast %17 : vector<256x128xf32> to vector<8x32x128xf32>
    %19 = vector.extract_strided_slice %18 {offsets = [0, 2, 0], sizes = [8, 28, 128], strides = [1, 1, 1]} : vector<8x32x128xf32> to vector<8x28x128xf32>
    %20 = arith.addf %14, %19 : vector<8x28x128xf32>
    %c3 = arith.constant 3 : index
    %c0_12 = arith.constant 0 : index
    %c0_13 = arith.constant 0 : index
    %21 = vector.load %arg2[%c3, %c0_12, %c0_13] : memref<5x128x128xbf16, #tpu.memory_space<vmem>>, vector<1x128x128xbf16>
    %22 = vector.shape_cast %21 : vector<1x128x128xbf16> to vector<128x128xbf16>
    %cst_14 = arith.constant dense<0.000000e+00> : vector<256x128xf32>
    %23 = tpu.matmul %1, %22, %cst_14 {dimension_numbers = #tpu.dot_dimension_numbers<[1], [0], [0], [1], [0, 0, 1, 1], [], []>} : vector<256x128xbf16>, vector<128x128xbf16>, vector<256x128xf32> -> vector<256x128xf32>
    %24 = vector.shape_cast %23 : vector<256x128xf32> to vector<8x32x128xf32>
    %25 = vector.extract_strided_slice %24 {offsets = [0, 3, 0], sizes = [8, 28, 128], strides = [1, 1, 1]} : vector<8x32x128xf32> to vector<8x28x128xf32>
    %26 = arith.addf %20, %25 : vector<8x28x128xf32>
    %c4 = arith.constant 4 : index
    %c0_15 = arith.constant 0 : index
    %c0_16 = arith.constant 0 : index
    %27 = vector.load %arg2[%c4, %c0_15, %c0_16] : memref<5x128x128xbf16, #tpu.memory_space<vmem>>, vector<1x128x128xbf16>
    %28 = vector.shape_cast %27 : vector<1x128x128xbf16> to vector<128x128xbf16>
    %cst_17 = arith.constant dense<0.000000e+00> : vector<256x128xf32>
    %29 = tpu.matmul %1, %28, %cst_17 {dimension_numbers = #tpu.dot_dimension_numbers<[1], [0], [0], [1], [0, 0, 1, 1], [], []>} : vector<256x128xbf16>, vector<128x128xbf16>, vector<256x128xf32> -> vector<256x128xf32>
    %30 = vector.shape_cast %29 : vector<256x128xf32> to vector<8x32x128xf32>
    %31 = vector.extract_strided_slice %30 {offsets = [0, 4, 0], sizes = [8, 28, 128], strides = [1, 1, 1]} : vector<8x32x128xf32> to vector<8x28x128xf32>
    %32 = arith.addf %26, %31 : vector<8x28x128xf32>
    %c0_18 = arith.constant 0 : index
    %c0_19 = arith.constant 0 : index
    %33 = vector.load %arg3[%c0_18, %c0_19] : memref<1x128xf32, #tpu.memory_space<vmem>>, vector<1x128xf32>
    %34 = vector.shape_cast %33 : vector<1x128xf32> to vector<1x1x128xf32>
    %35 = vector.broadcast %34 : vector<1x1x128xf32> to vector<8x28x128xf32>
    %36 = arith.addf %32, %35 : vector<8x28x128xf32>
    %cst_20 = arith.constant 0.000000e+00 : f32
    %37 = vector.broadcast %cst_20 : f32 to vector<8x28x128xf32>
    %38 = arith.maximumf %36, %37 : vector<8x28x128xf32>
    %cst_21 = arith.constant dense<0xFF800000> : vector<8x128xf32>
    %39 = vector.multi_reduction <maximumf>, %38, %cst_21 [1] : vector<8x28x128xf32> to vector<8x128xf32>
    %c0_22 = arith.constant 0 : index
    %c0_23 = arith.constant 0 : index
    %40 = vector.load %arg4[%c0_22, %c0_23] : memref<8x128xf32, #tpu.memory_space<vmem>>, vector<8x128xf32>
    tpu.vector_store %arg4[%c0_22, %c0_23], %39 {strides = array<i32>} : memref<8x128xf32, #tpu.memory_space<vmem>>, vector<8x128xf32>,
    return
  }
  func.func @transform_0(%arg0: i32) -> (i32, i32, i32) {
    %c0_i32 = arith.constant 0 : i32
    %c0_i32_0 = arith.constant 0 : i32
    %c0_i32_1 = arith.constant 0 : i32
    return %arg0, %c0_i32, %c0_i32_0 : i32, i32, i32
  }
  func.func @transform_1(%arg0: i32) -> (i32, i32, i32) {
    %c0_i32 = arith.constant 0 : i32
    %c0_i32_0 = arith.constant 0 : i32
    %c0_i32_1 = arith.constant 0 : i32
    %c0_i32_2 = arith.constant 0 : i32
    return %c0_i32, %c0_i32_0, %c0_i32_1 : i32, i32, i32
  }
  func.func @transform_2(%arg0: i32) -> (i32, i32) {
    %c0_i32 = arith.constant 0 : i32
    %c0_i32_0 = arith.constant 0 : i32
    %c0_i32_1 = arith.constant 0 : i32
    return %c0_i32, %c0_i32_0 : i32, i32
  }
  func.func @transform_3(%arg0: i32) -> (i32, i32) {
    %c0_i32 = arith.constant 0 : i32
    %c0_i32_0 = arith.constant 0 : i32
    return %arg0, %c0_i32 : i32, i32
  }
}

</mosaic_0001>

<bundles_post_ra>
// kernel: tpu_custom_call.1
= control target key start
LH: loop header
LB: loop body
LE: loop exit
PB: predicated region body
PF: predicated region fallthrough
CT: control target
= control target key end

     0   :  { %8 = vsyncpa [#allocation3], 0  ;;  %s3236_s0 = inlined_call_operand.hbm [shape: bf16[8,32,128], index: 0, kind: input, shape index: {}]   ;;  %s3237_s1 = inlined_call_operand.hbm [shape: bf16[5,128,128], index: 1, kind: input, shape index: {}]   ;;  %s3238_s2 = inlined_call_operand.vmem [shape: f32[1,128], index: 2, kind: input, shape index: {}]   ;;  %s3239_s3 = inlined_call_operand.hbm [shape: f32[8,128], index: 3, kind: output, shape index: {}]  }
   0x1   :  { %9 = vsyncpa [#allocation6], 0 }
   0x2   :  { %10 = vsyncpa [#allocation4], 0  ;;  %s2696_s12 = smov [#allocation2]  }
   0x3   :  { %s16_s13 = sshll.u32 %s2696_s12, 4  ;;  %s17_s13 = int_to_ptr.vmem [resolvable:$true] %s16_s13 }
   0x4   :  { %s2638_s14 = scalar_lea.vmem %s17_s13, 2048  ;;  %p2643_p1 = scmp.lt.s32.totalorder %s17_s13, %s17_s13 }
   0x5   :  { %p2639_p0 = scmp.ne.s32.totalorder %s17_s13, %s2638_s14  ;;  %p2644_p2 = scmp.lt.s32.totalorder %s2638_s14, %s2638_s14 }
   0x7   :  { %p2645_p3 = por %p2644_p2, %p2643_p1 }
   0x9   :  { %p2646_p4 = pnand %p2645_p3, %p2639_p0 }
   0xb   :  { %2649 = shalt.err (!%p2646_p4)
}
   0xc   :  { %s2697_s15 = smov 64   ;;  %s2698_s16 = smov 4  }
   0xd   :  { %22 = dma.hbm_to_vmem [thread:$0]  %s3236_s0, 2048, %s17_s13, [#allocation3], %s2697_s15, %s2697_s15, %s2698_s16  }
   0xe   :  { %s2699_s19 = smov [#allocation5]  }
   0xf   :  { %s28_s20 = sshll.u32 %s2699_s19, 4  ;;  %s29_s20 = int_to_ptr.vmem [resolvable:$true] %s28_s20 }
  0x10   :  { %s2658_s21 = scalar_lea.vmem %s29_s20, 5120  ;;  %p2663_p6 = scmp.lt.s32.totalorder %s29_s20, %s29_s20 }
  0x11   :  { %p2659_p5 = scmp.ne.s32.totalorder %s29_s20, %s2658_s21  ;;  %p2664_p7 = scmp.lt.s32.totalorder %s2658_s21, %s2658_s21 }
  0x13   :  { %p2665_p8 = por %p2664_p7, %p2663_p6 }
  0x15   :  { %p2666_p9 = pnand %p2665_p8, %p2659_p5 }
  0x17   :  { %2669 = shalt.err (!%p2666_p9)
}
  0x18   :  { %34 = dma.hbm_to_vmem [thread:$0]  %s3237_s1, 5120, %s29_s20, [#allocation6], %s2697_s15, %s2697_s15, %s2698_s16  }
  0x19   :  { %2690 = dma.done.wait [#allocation3], 2048  }
  0x1a   :  { %2691 = vsyncadd [#allocation3], 4294965248 }
  0x1b   :  { %2692 = dma.done.wait [#allocation6], 5120  }
  0x1c   :  { %2693 = vsyncadd [#allocation6], 4294962176  ;;  %v2574_v0 = vld [vmem:[#allocation5 + $0x38] sm:$0xff]   ;;  %v2575_v1 = vld [vmem:[#allocation5 + $0x30] sm:$0xff]   ;;  %vm687_vm0 = vcmask 1046528   ;;  %vm1066_vm1 = vcmask 1045504  }
  0x1d   :  { %2313 = vmatprep.subr.bf16.mxu0 %v2574_v0  ;;  %2553 = vmatprep.subr.bf16.mxu1 %v2574_v0  ;;  %v2576_v2 = vld [vmem:[#allocation5 + $0x28] sm:$0xff]   ;;  %v2577_v3 = vld [vmem:[#allocation5 + $0x20] sm:$0xff]   ;;  %v2578_v6 = vld [vmem:[#allocation5 + $0x18] sm:$0xff]   ;;  %vm1445_vm2 = vcmask 1044480   ;;  %vm1824_vm3 = vcmask 1043456   ;;  %vm2104_vm4 = vcmask 1041409  }
  0x1e   :  { %2314 = vmatpush3.bf16.msra.mxu0 %v2574_v0  ;;  %2561 = vmatpush3.bf16.msra.mxu1 %v2574_v0  ;;  %v2727_v4 = vld [vmem:[#allocation2] sm:$0xff]   ;;  %v2579_v7 = vld [vmem:[#allocation5 + $0x10] sm:$0xff]   ;;  %v2580_v8 = vld [vmem:[#allocation5 + $0x8] sm:$0xff]   ;;  %vm2106_vm5 = vcmask 1042434   ;;  %vm2108_vm6 = vcmask 1043459   ;;  %vm2110_vm7 = vcmask 1044484  }
  0x1f   :  { %2315 = vmatprep.subr.bf16.mxu0 %v2575_v1  ;;  %2554 = vmatprep.subr.bf16.mxu1 %v2575_v1  ;;  %v2729_v5 = vld [vmem:[#allocation2 + $0x40] sm:$0xff]   ;;  %v2586_v10 = vld [vmem:[#allocation5 + $0x78] sm:$0xff]   ;;  %v2733_v11 = vld [vmem:[#allocation2 + $0x8] sm:$0xff]   ;;  %vm2112_vm8 = vcmask 1045509   ;;  %vm2114_vm9 = vcmask 1046534   ;;  %vm2116_vm10 = vcmask 1047559  }
  0x20   :  { %2329 = vmatprep.mubr.bf16.mxu0 %v2727_v4  ;;  %2345 = vmatprep.mubr.bf16.mxu1 %v2729_v5  ;;  %v2581_v9 = vld [vmem:[#allocation5] sm:$0xff]   ;;  %v2587_v12 = vld [vmem:[#allocation5 + $0xb8] sm:$0xff]   ;;  %v2735_v13 = vld [vmem:[#allocation2 + $0x48] sm:$0xff]  }
  0x21   :  { %v2588_v14 = vld [vmem:[#allocation5 + $0x70] sm:$0xff]   ;;  %v2594_v18 = vld [vmem:[#allocation5 + $0x68] sm:$0xff]   ;;  %v2743_v19 = vld [vmem:[#allocation2 + $0x18] sm:$0xff]  }
  0x22   :  { %2316 = vmatpush3.bf16.msra.mxu0 %v2575_v1  ;;  %2562 = vmatpush3.bf16.msra.mxu1 %v2575_v1  ;;  %v2589_v15 = vld [vmem:[#allocation5 + $0xb0] sm:$0xff]   ;;  %v2595_v20 = vld [vmem:[#allocation5 + $0xa8] sm:$0xff]   ;;  %v2747_v21 = vld [vmem:[#allocation2 + $0x58] sm:$0xff]  }
  0x23   :  { %2317 = vmatprep.subr.bf16.mxu0 %v2576_v2  ;;  %2555 = vmatprep.subr.bf16.mxu1 %v2576_v2  ;;  %v2737_v16 = vld [vmem:[#allocation2 + $0x10] sm:$0xff]   ;;  %v2596_v22 = vld [vmem:[#allocation5 + $0x60] sm:$0xff]   ;;  %v2602_v26 = vld [vmem:[#allocation5 + $0x58] sm:$0xff]  }
  0x24   :  { %v2739_v17 = vld [vmem:[#allocation2 + $0x50] sm:$0xff]   ;;  %v2597_v23 = vld [vmem:[#allocation5 + $0xa0] sm:$0xff]   ;;  %v2755_v27 = vld [vmem:[#allocation2 + $0x28] sm:$0xff]  }
  0x25   :  { %v2749_v24 = vld [vmem:[#allocation2 + $0x20] sm:$0xff]   ;;  %v2603_v28 = vld [vmem:[#allocation5 + $0x98] sm:$0xff]   ;;  %v2759_v29 = vld [vmem:[#allocation2 + $0x68] sm:$0xff]  }
  0x26   :  { %2318 = vmatpush3.bf16.msra.mxu0 %v2576_v2  ;;  %2563 = vmatpush3.bf16.msra.mxu1 %v2576_v2  ;;  %v2751_v25 = vld [vmem:[#allocation2 + $0x60] sm:$0xff]   ;;  %v2604_v30 = vld [vmem:[#allocation5 + $0x50] sm:$0xff]   ;;  %v2610_v34 = vld [vmem:[#allocation5 + $0x48] sm:$0xff]  }
  0x27   :  { %2319 = vmatprep.subr.bf16.mxu0 %v2577_v3  ;;  %2556 = vmatprep.subr.bf16.mxu1 %v2577_v3  ;;  %v2605_v31 = vld [vmem:[#allocation5 + $0x90] sm:$0xff]   ;;  %v2611_v35 = vld [vmem:[#allocation5 + $0x88] sm:$0xff]   ;;  %v2769_v36 = vld [vmem:[#allocation2 + $0x38] sm:$0xff]  }
  0x28   :  { %v2761_v32 = vld [vmem:[#allocation2 + $0x30] sm:$0xff]   ;;  %v2771_v37 = vld [vmem:[#allocation2 + $0x78] sm:$0xff]   ;;  %v2612_v38 = vld [vmem:[#allocation5 + $0x40] sm:$0xff]  }
  0x29   :  { %v2763_v33 = vld [vmem:[#allocation2 + $0x70] sm:$0xff]   ;;  %v2613_v39 = vld [vmem:[#allocation5 + $0x80] sm:$0xff]   ;;  %v2614_v40 = vld [vmem:[#allocation5 + $0xf8] sm:$0xff]  }
  0x2a   :  { %2320 = vmatpush3.bf16.msra.mxu0 %v2577_v3  ;;  %2564 = vmatpush3.bf16.msra.mxu1 %v2577_v3  ;;  %v2615_v41 = vld [vmem:[#allocation5 + $0x138] sm:$0xff]   ;;  %v2616_v42 = vld [vmem:[#allocation5 + $0xf0] sm:$0xff]   ;;  %v2618_v44 = vld [vmem:[#allocation5 + $0xe8] sm:$0xff]  }
  0x2b   :  { %2321 = vmatprep.subr.bf16.mxu0 %v2578_v6  ;;  %2557 = vmatprep.subr.bf16.mxu1 %v2578_v6  ;;  %v2617_v43 = vld [vmem:[#allocation5 + $0x130] sm:$0xff]   ;;  %v2619_v45 = vld [vmem:[#allocation5 + $0x128] sm:$0xff]   ;;  %v2620_v46 = vld [vmem:[#allocation5 + $0xe0] sm:$0xff]  }
  0x2c   :  { %v2621_v47 = vld [vmem:[#allocation5 + $0x120] sm:$0xff]   ;;  %v2622_v48 = vld [vmem:[#allocation5 + $0xd8] sm:$0xff]   ;;  %v2624_v50 = vld [vmem:[#allocation5 + $0xd0] sm:$0xff]  }
  0x2d   :  { %v2623_v49 = vld [vmem:[#allocation5 + $0x118] sm:$0xff]   ;;  %v2625_v51 = vld [vmem:[#allocation5 + $0x110] sm:$0xff]   ;;  %v2626_v52 = vld [vmem:[#allocation5 + $0xc8] sm:$0xff]  }
  0x2e   :  { %2322 = vmatpush3.bf16.msra.mxu0 %v2578_v6  ;;  %2565 = vmatpush3.bf16.msra.mxu1 %v2578_v6  ;;  %v2627_v53 = vld [vmem:[#allocation5 + $0x108] sm:$0xff]   ;;  %v2628_v54 = vld [vmem:[#allocation5 + $0xc0] sm:$0xff]  }
  0x2f   :  { %2323 = vmatprep.subr.bf16.mxu0 %v2579_v7  ;;  %2558 = vmatprep.subr.bf16.mxu1 %v2579_v7  ;;  %v2629_v55 = vld [vmem:[#allocation5 + $0x100] sm:$0xff]  }
  0x32   :  { %2324 = vmatpush3.bf16.msra.mxu0 %v2579_v7  ;;  %2566 = vmatpush3.bf16.msra.mxu1 %v2579_v7 }
  0x33   :  { %2325 = vmatprep.subr.bf16.mxu0 %v2580_v8  ;;  %2559 = vmatprep.subr.bf16.mxu1 %v2580_v8 }
  0x36   :  { %2326 = vmatpush3.bf16.msra.mxu0 %v2580_v8  ;;  %2567 = vmatpush3.bf16.msra.mxu1 %v2580_v8 }
  0x37   :  { %2327 = vmatprep.subr.bf16.mxu0 %v2581_v9  ;;  %2560 = vmatprep.subr.bf16.mxu1 %v2581_v9 }
  0x3a   :  { %2328 = vmatpush3.bf16.msra.mxu0 %v2581_v9  ;;  %2568 = vmatpush3.bf16.msra.mxu1 %v2581_v9 }
  0x3b   :  { %2361 = vmatprep.subr.bf16.mxu1 %v2586_v10  ;;  %2409 = vmatprep.subr.bf16.mxu0 %v2587_v12 }
  0x3d   :  { %2330 = vmatmul.mubr.bf16.vlgmr.msra.gmra.mxu0 %v2733_v11  ;;  %2346 = vmatmul.mubr.bf16.vlgmr.msra.gmra.mxu1 %v2735_v13 }
  0x3e   :  { %2362 = vmatpush3.bf16.msra.mxu1 %v2586_v10  ;;  %2410 = vmatpush3.bf16.msra.mxu0 %v2587_v12 }
  0x3f   :  { %2363 = vmatprep.subr.bf16.mxu1 %v2588_v14  ;;  %2411 = vmatprep.subr.bf16.mxu0 %v2589_v15 }
  0x40   :  { %2333 = vmatprep.mubr.bf16.mxu0 %v2737_v16  ;;  %2349 = vmatprep.mubr.bf16.mxu1 %v2739_v17 }
  0x42   :  { %2364 = vmatpush3.bf16.msra.mxu1 %v2588_v14  ;;  %2412 = vmatpush3.bf16.msra.mxu0 %v2589_v15 }
  0x43   :  { %2365 = vmatprep.subr.bf16.mxu1 %v2594_v18  ;;  %2413 = vmatprep.subr.bf16.mxu0 %v2595_v20 }
  0x45   :  { %2334 = vmatmul.mubr.bf16.gmra.mxu0 %v2743_v19  ;;  %2350 = vmatmul.mubr.bf16.gmra.mxu1 %v2747_v21 }
  0x46   :  { %2366 = vmatpush3.bf16.msra.mxu1 %v2594_v18  ;;  %2414 = vmatpush3.bf16.msra.mxu0 %v2595_v20 }
  0x47   :  { %2367 = vmatprep.subr.bf16.mxu1 %v2596_v22  ;;  %2415 = vmatprep.subr.bf16.mxu0 %v2597_v23 }
  0x48   :  { %2337 = vmatprep.mubr.bf16.mxu0 %v2749_v24  ;;  %2353 = vmatprep.mubr.bf16.mxu1 %v2751_v25 }
  0x4a   :  { %2368 = vmatpush3.bf16.msra.mxu1 %v2596_v22  ;;  %2416 = vmatpush3.bf16.msra.mxu0 %v2597_v23 }
  0x4b   :  { %2369 = vmatprep.subr.bf16.mxu1 %v2602_v26  ;;  %2417 = vmatprep.subr.bf16.mxu0 %v2603_v28 }
  0x4d   :  { %2338 = vmatmul.mubr.bf16.gmra.mxu0 %v2755_v27  ;;  %2354 = vmatmul.mubr.bf16.gmra.mxu1 %v2759_v29 }
  0x4e   :  { %2370 = vmatpush3.bf16.msra.mxu1 %v2602_v26  ;;  %2418 = vmatpush3.bf16.msra.mxu0 %v2603_v28 }
  0x4f   :  { %2371 = vmatprep.subr.bf16.mxu1 %v2604_v30  ;;  %2419 = vmatprep.subr.bf16.mxu0 %v2605_v31 }
  0x50   :  { %2341 = vmatprep.mubr.bf16.mxu0 %v2761_v32  ;;  %2357 = vmatprep.mubr.bf16.mxu1 %v2763_v33 }
  0x52   :  { %2372 = vmatpush3.bf16.msra.mxu1 %v2604_v30  ;;  %2420 = vmatpush3.bf16.msra.mxu0 %v2605_v31 }
  0x53   :  { %2373 = vmatprep.subr.bf16.mxu1 %v2610_v34  ;;  %2421 = vmatprep.subr.bf16.mxu0 %v2611_v35 }
  0x55   :  { %2342 = vmatmul.mubr.bf16.gmra.mxu0 %v2769_v36  ;;  %2358 = vmatmul.mubr.bf16.gmra.mxu1 %v2771_v37 }
  0x56   :  { %2374 = vmatpush3.bf16.msra.mxu1 %v2610_v34  ;;  %2422 = vmatpush3.bf16.msra.mxu0 %v2611_v35 }
  0x57   :  { %2375 = vmatprep.subr.bf16.mxu1 %v2612_v38  ;;  %2423 = vmatprep.subr.bf16.mxu0 %v2613_v39 }
  0x58   :  { %2377 = vmatprep.mubr.bf16.mxu1 %v2727_v4  ;;  %2425 = vmatprep.mubr.bf16.mxu0 %v2727_v4 }
  0x5a   :  { %2376 = vmatpush3.bf16.msra.mxu1 %v2612_v38  ;;  %2424 = vmatpush3.bf16.msra.mxu0 %v2613_v39 }
  0x5b   :  { %2457 = vmatprep.subr.bf16.mxu1 %v2614_v40  ;;  %2505 = vmatprep.subr.bf16.mxu0 %v2615_v41 }
  0x5d   :  { %2378 = vmatmul.mubr.bf16.vlgmr.msra.gmra.mxu1 %v2733_v11  ;;  %2426 = vmatmul.mubr.bf16.vlgmr.msra.gmra.mxu0 %v2733_v11 }
  0x5e   :  { %2458 = vmatpush3.bf16.msra.mxu1 %v2614_v40  ;;  %2506 = vmatpush3.bf16.msra.mxu0 %v2615_v41 }
  0x5f   :  { %2381 = vmatprep.mubr.bf16.mxu1 %v2737_v16  ;;  %2429 = vmatprep.mubr.bf16.mxu0 %v2737_v16 }
  0x60   :  { %2459 = vmatprep.subr.bf16.mxu1 %v2616_v42  ;;  %2507 = vmatprep.subr.bf16.mxu0 %v2617_v43 }
  0x62   :  { %2460 = vmatpush3.bf16.msra.mxu1 %v2616_v42  ;;  %2508 = vmatpush3.bf16.msra.mxu0 %v2617_v43 }
  0x63   :  { %2461 = vmatprep.subr.bf16.mxu1 %v2618_v44  ;;  %2509 = vmatprep.subr.bf16.mxu0 %v2619_v45 }
  0x65   :  { %2382 = vmatmul.mubr.bf16.gmra.mxu1 %v2743_v19  ;;  %2430 = vmatmul.mubr.bf16.gmra.mxu0 %v2743_v19 }
  0x66   :  { %2385 = vmatprep.mubr.bf16.mxu1 %v2749_v24  ;;  %2433 = vmatprep.mubr.bf16.mxu0 %v2749_v24 }
  0x67   :  { %2462 = vmatpush3.bf16.msra.mxu1 %v2618_v44  ;;  %2510 = vmatpush3.bf16.msra.mxu0 %v2619_v45 }
  0x68   :  { %2463 = vmatprep.subr.bf16.mxu1 %v2620_v46  ;;  %2511 = vmatprep.subr.bf16.mxu0 %v2621_v47 }
  0x6b   :  { %2464 = vmatpush3.bf16.msra.mxu1 %v2620_v46  ;;  %2512 = vmatpush3.bf16.msra.mxu0 %v2621_v47 }
  0x6c   :  { %2465 = vmatprep.subr.bf16.mxu1 %v2622_v48  ;;  %2513 = vmatprep.subr.bf16.mxu0 %v2623_v49 }
  0x6d   :  { %2386 = vmatmul.mubr.bf16.gmra.mxu1 %v2755_v27  ;;  %2434 = vmatmul.mubr.bf16.gmra.mxu0 %v2755_v27 }
  0x6e   :  { %2389 = vmatprep.mubr.bf16.mxu1 %v2761_v32  ;;  %2437 = vmatprep.mubr.bf16.mxu0 %v2761_v32 }
  0x6f   :  { %2466 = vmatpush3.bf16.msra.mxu1 %v2622_v48  ;;  %2514 = vmatpush3.bf16.msra.mxu0 %v2623_v49 }
  0x70   :  { %2467 = vmatprep.subr.bf16.mxu1 %v2624_v50  ;;  %2515 = vmatprep.subr.bf16.mxu0 %v2625_v51 }
  0x73   :  { %2468 = vmatpush3.bf16.msra.mxu1 %v2624_v50  ;;  %2516 = vmatpush3.bf16.msra.mxu0 %v2625_v51 }
  0x74   :  { %2469 = vmatprep.subr.bf16.mxu1 %v2626_v52  ;;  %2517 = vmatprep.subr.bf16.mxu0 %v2627_v53 }
  0x75   :  { %2390 = vmatmul.mubr.bf16.gmra.mxu1 %v2769_v36  ;;  %2438 = vmatmul.mubr.bf16.gmra.mxu0 %v2769_v36 }
  0x76   :  { %2393 = vmatprep.mubr.bf16.mxu1 %v2729_v5  ;;  %2441 = vmatprep.mubr.bf16.mxu0 %v2729_v5 }
  0x77   :  { %2470 = vmatpush3.bf16.msra.mxu1 %v2626_v52  ;;  %2518 = vmatpush3.bf16.msra.mxu0 %v2627_v53 }
  0x78   :  { %2471 = vmatprep.subr.bf16.mxu1 %v2628_v54  ;;  %2519 = vmatprep.subr.bf16.mxu0 %v2629_v55 }
  0x7b   :  { %2472 = vmatpush3.bf16.msra.mxu1 %v2628_v54  ;;  %2520 = vmatpush3.bf16.msra.mxu0 %v2629_v55 }
  0x7d   :  { %2394 = vmatmul.mubr.bf16.gmra.mxu1 %v2735_v13  ;;  %2442 = vmatmul.mubr.bf16.gmra.mxu0 %v2735_v13 }
  0x7e   :  { %2397 = vmatprep.mubr.bf16.mxu1 %v2739_v17  ;;  %2445 = vmatprep.mubr.bf16.mxu0 %v2739_v17 }
  0x85   :  { %2398 = vmatmul.mubr.bf16.gmra.mxu1 %v2747_v21  ;;  %2446 = vmatmul.mubr.bf16.gmra.mxu0 %v2747_v21 }
  0x86   :  { %2401 = vmatprep.mubr.bf16.mxu1 %v2751_v25  ;;  %2449 = vmatprep.mubr.bf16.mxu0 %v2751_v25 }
  0x8d   :  { %2402 = vmatmul.mubr.bf16.gmra.mxu1 %v2759_v29  ;;  %2450 = vmatmul.mubr.bf16.gmra.mxu0 %v2759_v29 }
  0x8e   :  { %2405 = vmatprep.mubr.bf16.mxu1 %v2763_v33  ;;  %2453 = vmatprep.mubr.bf16.mxu0 %v2763_v33 }
  0x95   :  { %2406 = vmatmul.mubr.bf16.gmra.mxu1 %v2771_v37  ;;  %2454 = vmatmul.mubr.bf16.gmra.mxu0 %v2771_v37 }
  0x96   :  { %2473 = vmatprep.mubr.bf16.mxu1 %v2727_v4  ;;  %2521 = vmatprep.mubr.bf16.mxu0 %v2727_v4 }
  0x9d   :  { %2474 = vmatmul.mubr.bf16.vlgmr.msra.gmra.mxu1 %v2733_v11  ;;  %2522 = vmatmul.mubr.bf16.vlgmr.msra.gmra.mxu0 %v2733_v11 }
  0x9e   :  { %2477 = vmatprep.mubr.bf16.mxu1 %v2737_v16  ;;  %2525 = vmatprep.mubr.bf16.mxu0 %v2737_v16 }
  0xa5   :  { %2478 = vmatmul.mubr.bf16.gmra.mxu1 %v2743_v19  ;;  %2526 = vmatmul.mubr.bf16.gmra.mxu0 %v2743_v19 }
  0xa6   :  { %2481 = vmatprep.mubr.bf16.mxu1 %v2749_v24  ;;  %2529 = vmatprep.mubr.bf16.mxu0 %v2749_v24 }
  0xad   :  { %2482 = vmatmul.mubr.bf16.gmra.mxu1 %v2755_v27  ;;  %2530 = vmatmul.mubr.bf16.gmra.mxu0 %v2755_v27 }
  0xae   :  { %2485 = vmatprep.mubr.bf16.mxu1 %v2761_v32  ;;  %2533 = vmatprep.mubr.bf16.mxu0 %v2761_v32 }
  0xb5   :  { %2486 = vmatmul.mubr.bf16.gmra.mxu1 %v2769_v36  ;;  %2534 = vmatmul.mubr.bf16.gmra.mxu0 %v2769_v36 }
  0xb6   :  { %2489 = vmatprep.mubr.bf16.mxu1 %v2729_v5  ;;  %2537 = vmatprep.mubr.bf16.mxu0 %v2729_v5 }
  0xbd   :  { %2490 = vmatmul.mubr.bf16.gmra.mxu1 %v2735_v13  ;;  %2538 = vmatmul.mubr.bf16.gmra.mxu0 %v2735_v13 }
  0xbe   :  { %2493 = vmatprep.mubr.bf16.mxu1 %v2739_v17  ;;  %2541 = vmatprep.mubr.bf16.mxu0 %v2739_v17 }
  0xc5   :  { %2494 = vmatmul.mubr.bf16.gmra.mxu1 %v2747_v21  ;;  %2542 = vmatmul.mubr.bf16.gmra.mxu0 %v2747_v21 }
  0xc6   :  { %2497 = vmatprep.mubr.bf16.mxu1 %v2751_v25  ;;  %2545 = vmatprep.mubr.bf16.mxu0 %v2751_v25 }
  0xcd   :  { %2498 = vmatmul.mubr.bf16.gmra.mxu1 %v2759_v29  ;;  %2546 = vmatmul.mubr.bf16.gmra.mxu0 %v2759_v29 }
  0xce   :  { %2501 = vmatprep.mubr.bf16.mxu1 %v2763_v33  ;;  %2549 = vmatprep.mubr.bf16.mxu0 %v2763_v33 }
  0xd5   :  { %2502 = vmatmul.mubr.bf16.gmra.mxu1 %v2771_v37  ;;  %2550 = vmatmul.mubr.bf16.gmra.mxu0 %v2771_v37 }
  0xfd   :  { %v2331_v56 = vpop.f32.mrf.mxu0  ;;  %v2839_v57 = vpop.f32.mrf.mxu1 }
  0xff   :  { %v270_v58 = vpop.f32.mrf.mxu0  ;;  %v2841_v59 = vpop.f32.mrf.mxu1 }
 0x101   :  { %v2332_v60 = vpop.f32.mrf.mxu0  ;;  %v2843_v61 = vpop.f32.mrf.mxu1 }
 0x103   :  { %v273_v62 = vpop.f32.mrf.mxu0  ;;  %v2845_v63 = vpop.f32.mrf.mxu1 }
 0x105   :  { %v2847_v0 = vpop.f32.mrf.mxu0  ;;  %v2849_v1 = vpop.f32.mrf.mxu1 }
 0x107   :  { %v2851_v2 = vpop.f32.mrf.mxu0  ;;  %v2853_v3 = vpop.f32.mrf.mxu1 }
 0x109   :  { %v2855_v4 = vpop.f32.mrf.mxu0  ;;  %v2857_v5 = vpop.f32.mrf.mxu1 }
 0x10b   :  { %v2859_v6 = vpop.f32.mrf.mxu0  ;;  %v2861_v7 = vpop.f32.mrf.mxu1 }
 0x10d   :  { %v2863_v8 = vpop.f32.mrf.mxu0  ;;  %v2865_v9 = vpop.f32.mrf.mxu1 }
 0x10f   :  { %v2867_v10 = vpop.f32.mrf.mxu0  ;;  %v2869_v11 = vpop.f32.mrf.mxu1 }
 0x111   :  { %v2871_v12 = vpop.f32.mrf.mxu0  ;;  %v2873_v13 = vpop.f32.mrf.mxu1 }
 0x113   :  { %v2875_v14 = vpop.f32.mrf.mxu0  ;;  %v2877_v15 = vpop.f32.mrf.mxu1 }
 0x115   :  { %v2879_v16 = vpop.f32.mrf.mxu0  ;;  %v2881_v17 = vpop.f32.mrf.mxu1 }
 0x117   :  { %v2883_v18 = vpop.f32.mrf.mxu0  ;;  %v2885_v19 = vpop.f32.mrf.mxu1 }
 0x119   :  { %v2887_v20 = vpop.f32.mrf.mxu0  ;;  %v2889_v21 = vpop.f32.mrf.mxu1 }
 0x11b   :  { %v2891_v22 = vpop.f32.mrf.mxu0  ;;  %v2893_v23 = vpop.f32.mrf.mxu1 }
 0x11d   :  { %v2379_v24 = vpop.f32.mrf.mxu1  ;;  %v2427_v25 = vpop.f32.mrf.mxu0 }
 0x11e   :  { %v691_v30 = vrot.slane %v2379_v24, 1  ;;  %v1070_v31 = vrot.slane %v2427_v25, 2 }
 0x11f   :  { %v528_v26 = vpop.f32.mrf.mxu1  ;;  %v907_v27 = vpop.f32.mrf.mxu0 }
 0x120   :  { %v688_v34 = vrot.slane %v528_v26, 1  ;;  %v1067_v41 = vrot.slane %v907_v27, 2 }
 0x121   :  { %v2380_v28 = vpop.f32.mrf.mxu1  ;;  %v2428_v29 = vpop.f32.mrf.mxu0 }
 0x122   :  { %v693_v32 = vrot.slane %v2380_v28, 1  ;;  %v1072_v33 = vrot.slane %v2428_v29, 2 }
 0x123   :  { %v531_v35 = vpop.f32.mrf.mxu1  ;;  %v910_v36 = vpop.f32.mrf.mxu0 }
 0x124   :  { %v694_v37 = vsel %vm687_vm0, %v691_v30, %v693_v32  ;;  %v779_v38 = vadd.f32 %v2332_v60, %v693_v32  ;;  %v1073_v39 = vsel %vm1066_vm1, %v1070_v31, %v1072_v33  ;;  %v689_v40 = vrot.slane %v531_v35, 1 }
 0x125   :  { %v778_v42 = vadd.f32 %v2331_v56, %v694_v37  ;;  %v1068_v43 = vrot.slane %v910_v36, 2  ;;  %v2383_v44 = vpop.f32.mrf.mxu1  ;;  %v2431_v45 = vpop.f32.mrf.mxu0 }
 0x126   :  { %v2897_v46 = vadd.f32 %v1072_v33, %v779_v38  ;;  %v690_v47 = vsel %vm687_vm0, %v688_v34, %v689_v40  ;;  %v692_v48 = vsel %vm687_vm0, %v689_v40, %v691_v30  ;;  %v698_v26 = vrot.slane %v2383_v44, 1 }
 0x127   :  { %v2901_v49 = vadd.f32 %v1073_v39, %v778_v42  ;;  %v776_v50 = vadd.f32 %v690_v47, %v270_v58  ;;  %v777_v51 = vadd.f32 %v692_v48, %v273_v62  ;;  %v1069_v52 = vsel %vm1066_vm1, %v1067_v41, %v1068_v43  ;;  %v544_v53 = vpop.f32.mrf.mxu1  ;;  %v923_v54 = vpop.f32.mrf.mxu0 }
 0x128   :  { %v1071_v55 = vsel %vm1066_vm1, %v1068_v43, %v1070_v31  ;;  %v1077_v27 = vrot.slane %v2431_v45, 2  ;;  %v695_v30 = vrot.slane %v544_v53, 1  ;;  %v1074_v35 = vrot.slane %v923_v54, 2 }
 0x129   :  { %v2905_v56 = vadd.f32 %v1069_v52, %v776_v50  ;;  %v2907_v60 = vadd.f32 %v1071_v55, %v777_v51  ;;  %v2384_v24 = vpop.f32.mrf.mxu1  ;;  %v2432_v25 = vpop.f32.mrf.mxu0 }
 0x12a   :  { %v700_v28 = vrot.slane %v2384_v24, 1  ;;  %v1079_v29 = vrot.slane %v2432_v25, 2 }
 0x12b   :  { %v547_v32 = vpop.f32.mrf.mxu1  ;;  %v926_v58 = vpop.f32.mrf.mxu0 }
 0x12c   :  { %v701_v62 = vsel %vm687_vm0, %v698_v26, %v700_v28  ;;  %v783_v33 = vadd.f32 %v2855_v4, %v700_v28  ;;  %v1080_v34 = vsel %vm1066_vm1, %v1077_v27, %v1079_v29  ;;  %v696_v31 = vrot.slane %v547_v32, 1 }
 0x12d   :  { %v782_v36 = vadd.f32 %v2847_v0, %v701_v62  ;;  %v1075_v37 = vrot.slane %v926_v58, 2  ;;  %v2387_v38 = vpop.f32.mrf.mxu1  ;;  %v2435_v39 = vpop.f32.mrf.mxu0 }
 0x12e   :  { %v2913_v40 = vadd.f32 %v1079_v29, %v783_v33  ;;  %v697_v41 = vsel %vm687_vm0, %v695_v30, %v696_v31  ;;  %v699_v42 = vsel %vm687_vm0, %v696_v31, %v698_v26  ;;  %v705_v54 = vrot.slane %v2387_v38, 1 }
 0x12f   :  { %v2917_v43 = vadd.f32 %v1080_v34, %v782_v36  ;;  %v780_v44 = vadd.f32 %v697_v41, %v2851_v2  ;;  %v781_v4 = vadd.f32 %v699_v42, %v2859_v6  ;;  %v1076_v45 = vsel %vm1066_vm1, %v1074_v35, %v1075_v37  ;;  %v560_v47 = vpop.f32.mrf.mxu1  ;;  %v939_v48 = vpop.f32.mrf.mxu0 }
 0x130   :  { %v1078_v0 = vsel %vm1066_vm1, %v1075_v37, %v1077_v27  ;;  %v1084_v55 = vrot.slane %v2435_v39, 2  ;;  %v702_v26 = vrot.slane %v560_v47, 1  ;;  %v1081_v32 = vrot.slane %v939_v48, 2 }
 0x131   :  { %v2923_v50 = vadd.f32 %v1076_v45, %v780_v44  ;;  %v2925_v51 = vadd.f32 %v1078_v0, %v781_v4  ;;  %v2388_v52 = vpop.f32.mrf.mxu1  ;;  %v2436_v53 = vpop.f32.mrf.mxu0 }
 0x132   :  { %v707_v24 = vrot.slane %v2388_v52, 1  ;;  %v1086_v25 = vrot.slane %v2436_v53, 2 }
 0x133   :  { %v563_v2 = vpop.f32.mrf.mxu1  ;;  %v942_v28 = vpop.f32.mrf.mxu0 }
 0x134   :  { %v708_v6 = vsel %vm687_vm0, %v705_v54, %v707_v24  ;;  %v787_v29 = vadd.f32 %v2871_v12, %v707_v24  ;;  %v1087_v30 = vsel %vm1066_vm1, %v1084_v55, %v1086_v25  ;;  %v703_v27 = vrot.slane %v563_v2, 1 }
 0x135   :  { %v786_v58 = vadd.f32 %v2863_v8, %v708_v6  ;;  %v1082_v62 = vrot.slane %v942_v28, 2  ;;  %v2391_v33 = vpop.f32.mrf.mxu1  ;;  %v2439_v34 = vpop.f32.mrf.mxu0 }
 0x136   :  { %v2931_v31 = vadd.f32 %v1086_v25, %v787_v29  ;;  %v704_v35 = vsel %vm687_vm0, %v702_v26, %v703_v27  ;;  %v706_v36 = vsel %vm687_vm0, %v703_v27, %v705_v54  ;;  %v712_v48 = vrot.slane %v2391_v33, 1 }
 0x137   :  { %v2935_v37 = vadd.f32 %v1087_v30, %v786_v58  ;;  %v784_v38 = vadd.f32 %v704_v35, %v2867_v10  ;;  %v785_v12 = vadd.f32 %v706_v36, %v2875_v14  ;;  %v1083_v39 = vsel %vm1066_vm1, %v1081_v32, %v1082_v62  ;;  %v576_v41 = vpop.f32.mrf.mxu1  ;;  %v955_v42 = vpop.f32.mrf.mxu0 }
 0x138   :  { %v1085_v8 = vsel %vm1066_vm1, %v1082_v62, %v1084_v55  ;;  %v1091_v0 = vrot.slane %v2439_v34, 2  ;;  %v709_v54 = vrot.slane %v576_v41, 1  ;;  %v1088_v2 = vrot.slane %v955_v42, 2 }
 0x139   :  { %v2941_v44 = vadd.f32 %v1083_v39, %v784_v38  ;;  %v2943_v4 = vadd.f32 %v1085_v8, %v785_v12  ;;  %v2392_v45 = vpop.f32.mrf.mxu1  ;;  %v2440_v47 = vpop.f32.mrf.mxu0 }
 0x13a   :  { %v714_v52 = vrot.slane %v2392_v45, 1  ;;  %v1093_v53 = vrot.slane %v2440_v47, 2 }
 0x13b   :  { %v579_v10 = vpop.f32.mrf.mxu1  ;;  %v958_v24 = vpop.f32.mrf.mxu0 }
 0x13c   :  { %v715_v14 = vsel %vm687_vm0, %v712_v48, %v714_v52  ;;  %v791_v25 = vadd.f32 %v2887_v20, %v714_v52  ;;  %v1094_v26 = vsel %vm1066_vm1, %v1091_v0, %v1093_v53  ;;  %v710_v55 = vrot.slane %v579_v10, 1 }
 0x13d   :  { %v790_v28 = vadd.f32 %v2879_v16, %v715_v14  ;;  %v1089_v6 = vrot.slane %v958_v24, 2  ;;  %v2395_v29 = vpop.f32.mrf.mxu1  ;;  %v2443_v30 = vpop.f32.mrf.mxu0 }
 0x13e   :  { %v2949_v27 = vadd.f32 %v1093_v53, %v791_v25  ;;  %v711_v32 = vsel %vm687_vm0, %v709_v54, %v710_v55  ;;  %v713_v58 = vsel %vm687_vm0, %v710_v55, %v712_v48  ;;  %v719_v42 = vrot.slane %v2395_v29, 1 }
 0x13f   :  { %v2953_v62 = vadd.f32 %v1094_v26, %v790_v28  ;;  %v788_v33 = vadd.f32 %v711_v32, %v2883_v18  ;;  %v789_v20 = vadd.f32 %v713_v58, %v2891_v22  ;;  %v1090_v34 = vsel %vm1066_vm1, %v1088_v2, %v1089_v6  ;;  %v592_v35 = vpop.f32.mrf.mxu1  ;;  %v971_v36 = vpop.f32.mrf.mxu0 }
 0x140   :  { %v1092_v16 = vsel %vm1066_vm1, %v1089_v6, %v1091_v0  ;;  %v1098_v8 = vrot.slane %v2443_v30, 2  ;;  %v716_v48 = vrot.slane %v592_v35, 1  ;;  %v1095_v10 = vrot.slane %v971_v36, 2 }
 0x141   :  { %v2959_v38 = vadd.f32 %v1090_v34, %v788_v33  ;;  %v2961_v12 = vadd.f32 %v1092_v16, %v789_v20  ;;  %v2396_v39 = vpop.f32.mrf.mxu1  ;;  %v2444_v41 = vpop.f32.mrf.mxu0 }
 0x142   :  { %v721_v45 = vrot.slane %v2396_v39, 1  ;;  %v1100_v47 = vrot.slane %v2444_v41, 2 }
 0x143   :  { %v595_v18 = vpop.f32.mrf.mxu1  ;;  %v974_v52 = vpop.f32.mrf.mxu0 }
 0x144   :  { %v722_v22 = vsel %vm687_vm0, %v719_v42, %v721_v45  ;;  %v795_v53 = vadd.f32 %v2843_v61, %v721_v45  ;;  %v1101_v54 = vsel %vm1066_vm1, %v1098_v8, %v1100_v47  ;;  %v717_v0 = vrot.slane %v595_v18, 1 }
 0x145   :  { %v794_v24 = vadd.f32 %v2839_v57, %v722_v22  ;;  %v1096_v14 = vrot.slane %v974_v52, 2  ;;  %v2399_v25 = vpop.f32.mrf.mxu1  ;;  %v2447_v26 = vpop.f32.mrf.mxu0 }
 0x146   :  { %v2967_v55 = vadd.f32 %v1100_v47, %v795_v53  ;;  %v718_v2 = vsel %vm687_vm0, %v716_v48, %v717_v0  ;;  %v720_v28 = vsel %vm687_vm0, %v717_v0, %v719_v42  ;;  %v726_v36 = vrot.slane %v2399_v25, 1 }
 0x147   :  { %v2971_v6 = vadd.f32 %v1101_v54, %v794_v24  ;;  %v792_v29 = vadd.f32 %v718_v2, %v2841_v59  ;;  %v793_v61 = vadd.f32 %v720_v28, %v2845_v63  ;;  %v1097_v30 = vsel %vm1066_vm1, %v1095_v10, %v1096_v14  ;;  %v608_v32 = vpop.f32.mrf.mxu1  ;;  %v987_v58 = vpop.f32.mrf.mxu0 }
 0x148   :  { %v1099_v57 = vsel %vm1066_vm1, %v1096_v14, %v1098_v8  ;;  %v1105_v16 = vrot.slane %v2447_v26, 2  ;;  %v723_v42 = vrot.slane %v608_v32, 1  ;;  %v1102_v18 = vrot.slane %v987_v58, 2 }
 0x149   :  { %v2977_v33 = vadd.f32 %v1097_v30, %v792_v29  ;;  %v2979_v20 = vadd.f32 %v1099_v57, %v793_v61  ;;  %v2400_v34 = vpop.f32.mrf.mxu1  ;;  %v2448_v35 = vpop.f32.mrf.mxu0 }
 0x14a   :  { %v728_v39 = vrot.slane %v2400_v34, 1  ;;  %v1107_v41 = vrot.slane %v2448_v35, 2 }
 0x14b   :  { %v611_v59 = vpop.f32.mrf.mxu1  ;;  %v990_v45 = vpop.f32.mrf.mxu0 }
 0x14c   :  { %v729_v63 = vsel %vm687_vm0, %v726_v36, %v728_v39  ;;  %v799_v47 = vadd.f32 %v2857_v5, %v728_v39  ;;  %v1108_v48 = vsel %vm1066_vm1, %v1105_v16, %v1107_v41  ;;  %v724_v8 = vrot.slane %v611_v59, 1 }
 0x14d   :  { %v798_v52 = vadd.f32 %v2849_v1, %v729_v63  ;;  %v1103_v22 = vrot.slane %v990_v45, 2  ;;  %v2403_v53 = vpop.f32.mrf.mxu1  ;;  %v2451_v54 = vpop.f32.mrf.mxu0 }
 0x14e   :  { %v2985_v0 = vadd.f32 %v1107_v41, %v799_v47  ;;  %v725_v10 = vsel %vm687_vm0, %v723_v42, %v724_v8  ;;  %v727_v24 = vsel %vm687_vm0, %v724_v8, %v726_v36  ;;  %v733_v58 = vrot.slane %v2403_v53, 1 }
 0x14f   :  { %v2989_v14 = vadd.f32 %v1108_v48, %v798_v52  ;;  %v796_v25 = vadd.f32 %v725_v10, %v2853_v3  ;;  %v797_v5 = vadd.f32 %v727_v24, %v2861_v7  ;;  %v1104_v26 = vsel %vm1066_vm1, %v1102_v18, %v1103_v22  ;;  %v624_v2 = vpop.f32.mrf.mxu1  ;;  %v1003_v28 = vpop.f32.mrf.mxu0 }
 0x150   :  { %v1106_v1 = vsel %vm1066_vm1, %v1103_v22, %v1105_v16  ;;  %v1112_v57 = vrot.slane %v2451_v54, 2  ;;  %v730_v36 = vrot.slane %v624_v2, 1  ;;  %v1109_v59 = vrot.slane %v1003_v28, 2 }
 0x151   :  { %v2995_v29 = vadd.f32 %v1104_v26, %v796_v25  ;;  %v2997_v61 = vadd.f32 %v1106_v1, %v797_v5  ;;  %v2404_v30 = vpop.f32.mrf.mxu1  ;;  %v2452_v32 = vpop.f32.mrf.mxu0 }
 0x152   :  { %v735_v34 = vrot.slane %v2404_v30, 1  ;;  %v1114_v35 = vrot.slane %v2452_v32, 2 }
 0x153   :  { %v627_v3 = vpop.f32.mrf.mxu1  ;;  %v1006_v39 = vpop.f32.mrf.mxu0 }
 0x154   :  { %v736_v7 = vsel %vm687_vm0, %v733_v58, %v735_v34  ;;  %v803_v41 = vadd.f32 %v2873_v13, %v735_v34  ;;  %v1115_v42 = vsel %vm1066_vm1, %v1112_v57, %v1114_v35  ;;  %v731_v16 = vrot.slane %v627_v3, 1 }
 0x155   :  { %v802_v45 = vadd.f32 %v2865_v9, %v736_v7  ;;  %v1110_v63 = vrot.slane %v1006_v39, 2  ;;  %v2407_v47 = vpop.f32.mrf.mxu1  ;;  %v2455_v48 = vpop.f32.mrf.mxu0 }
 0x156   :  { %v3003_v8 = vadd.f32 %v1114_v35, %v803_v41  ;;  %v732_v18 = vsel %vm687_vm0, %v730_v36, %v731_v16  ;;  %v734_v52 = vsel %vm687_vm0, %v731_v16, %v733_v58  ;;  %v740_v28 = vrot.slane %v2407_v47, 1 }
 0x157   :  { %v3007_v22 = vadd.f32 %v1115_v42, %v802_v45  ;;  %v800_v53 = vadd.f32 %v732_v18, %v2869_v11  ;;  %v801_v13 = vadd.f32 %v734_v52, %v2877_v15  ;;  %v1111_v54 = vsel %vm1066_vm1, %v1109_v59, %v1110_v63  ;;  %v640_v10 = vpop.f32.mrf.mxu1  ;;  %v1019_v24 = vpop.f32.mrf.mxu0 }
 0x158   :  { %v1113_v9 = vsel %vm1066_vm1, %v1110_v63, %v1112_v57  ;;  %v1119_v1 = vrot.slane %v2455_v48, 2  ;;  %v737_v58 = vrot.slane %v640_v10, 1  ;;  %v1116_v42 = vrot.slane %v1019_v24, 2 }
 0x159   :  { %v3013_v25 = vadd.f32 %v1111_v54, %v800_v53  ;;  %v3015_v5 = vadd.f32 %v1113_v9, %v801_v13  ;;  %v2408_v26 = vpop.f32.mrf.mxu1  ;;  %v2456_v2 = vpop.f32.mrf.mxu0 }
 0x15a   :  { %v742_v30 = vrot.slane %v2408_v26, 1  ;;  %v1121_v32 = vrot.slane %v2456_v2, 2 }
 0x15b   :  { %v643_v11 = vpop.f32.mrf.mxu1  ;;  %v1022_v34 = vpop.f32.mrf.mxu0 }
 0x15c   :  { %v743_v15 = vsel %vm687_vm0, %v740_v28, %v742_v30  ;;  %v807_v35 = vadd.f32 %v2889_v21, %v742_v30  ;;  %v1122_v36 = vsel %vm1066_vm1, %v1119_v1, %v1121_v32  ;;  %v738_v57 = vrot.slane %v643_v11, 1 }
 0x15d   :  { %v806_v3 = vadd.f32 %v2881_v17, %v743_v15  ;;  %v1117_v39 = vrot.slane %v1022_v34, 2  ;;  %v2475_v7 = vpop.f32.mrf.mxu1  ;;  %v2523_v41 = vpop.f32.mrf.mxu0  ;;  %v3041_v34 = vld [vmem:[%s3238_s2] ss:$0 sm:$0xff]  ;;  %s2700_s2 = smov [#allocation7]  }
 0x15e   :  { %v3021_v16 = vadd.f32 %v1121_v32, %v807_v35  ;;  %v739_v59 = vsel %vm687_vm0, %v737_v58, %v738_v57  ;;  %v741_v45 = vsel %vm687_vm0, %v738_v57, %v740_v28  ;;  %v1449_v24 = vrot.slane %v2475_v7, 3  ;;  %s2126_s24 = sshll.u32 %s2700_s2, 4  ;;  %s2127_s24 = int_to_ptr.vmem [resolvable:$true] %s2126_s24 }
 0x15f   :  { %v3025_v63 = vadd.f32 %v1122_v36, %v806_v3  ;;  %v804_v47 = vadd.f32 %v739_v59, %v2885_v19  ;;  %v805_v21 = vadd.f32 %v741_v45, %v2893_v23  ;;  %v1286_v48 = vpop.f32.mrf.mxu1  ;;  %v1665_v18 = vpop.f32.mrf.mxu0  ;;  %v1118_v17 = vsel %vm1066_vm1, %v1116_v42, %v1117_v39  ;;  %s2670_s25 = scalar_lea.vmem %s2127_s24, 128  ;;  %p2675_p11 = scmp.lt.s32.totalorder %s2127_s24, %s2127_s24 }
 0x160   :  { %v1120_v52 = vsel %vm1066_vm1, %v1117_v39, %v1119_v1  ;;  %v1828_v2 = vrot.slane %v2523_v41, 4  ;;  %v1446_v28 = vrot.slane %v1286_v48, 3  ;;  %v1825_v58 = vrot.slane %v1665_v18, 4  ;;  %p2671_p10 = scmp.ne.s32.totalorder %s2127_s24, %s2670_s25  ;;  %p2676_p12 = scmp.lt.s32.totalorder %s2670_s25, %s2670_s25 }
 0x161   :  { %v3031_v53 = vadd.f32 %v1118_v17, %v804_v47  ;;  %v3033_v13 = vadd.f32 %v1120_v52, %v805_v21  ;;  %v2476_v54 = vpop.f32.mrf.mxu1  ;;  %v2524_v10 = vpop.f32.mrf.mxu0 }
 0x162   :  { %v1451_v9 = vrot.slane %v2476_v54, 3  ;;  %v1830_v26 = vrot.slane %v2524_v10, 4  ;;  %p2677_p13 = por %p2676_p12, %p2675_p11 }
 0x163   :  { %v1289_v19 = vpop.f32.mrf.mxu1  ;;  %v1668_v23 = vpop.f32.mrf.mxu0 }
 0x164   :  { %v1452_v30 = vsel %vm1445_vm2, %v1449_v24, %v1451_v9  ;;  %v1537_v32 = vadd.f32 %v1451_v9, %v2897_v46  ;;  %v1447_v1 = vrot.slane %v1289_v19, 3  ;;  %v1826_v15 = vrot.slane %v1668_v23, 4  ;;  %p2678_p0 = pnand %p2677_p13, %p2671_p10 }
 0x165   :  { %v1536_v11 = vadd.f32 %v1452_v30, %v2901_v49  ;;  %v2479_v35 = vpop.f32.mrf.mxu1  ;;  %v2527_v36 = vpop.f32.mrf.mxu0  ;;  %v1831_v57 = vsel %vm1824_vm3, %v1828_v2, %v1830_v26 }
 0x166   :  { %v1916_v3 = vadd.f32 %v1830_v26, %v1537_v32  ;;  %v1448_v39 = vsel %vm1445_vm2, %v1446_v28, %v1447_v1  ;;  %v1450_v7 = vsel %vm1445_vm2, %v1447_v1, %v1449_v24  ;;  %v1827_v47 = vsel %vm1824_vm3, %v1825_v58, %v1826_v15 }
 0x167   :  { %v1915_v46 = vadd.f32 %v1831_v57, %v1536_v11  ;;  %v1534_v41 = vadd.f32 %v1448_v39, %v2905_v56  ;;  %v1535_v49 = vadd.f32 %v1450_v7, %v2907_v60  ;;  %v1302_v42 = vpop.f32.mrf.mxu1  ;;  %v1681_v59 = vpop.f32.mrf.mxu0  ;;  %v1829_v21 = vsel %vm1824_vm3, %v1826_v15, %v1828_v2 }
 0x168   :  { %v1955_v45 = vadd.f32 %v3041_v34, %v1916_v3  ;;  %v1456_v52 = vrot.slane %v2479_v35, 3  ;;  %v1835_v9 = vrot.slane %v2527_v36, 4  ;;  %v1453_v23 = vrot.slane %v1302_v42, 3 }
 0x169   :  { %v1954_v48 = vadd.f32 %v3041_v34, %v1915_v46  ;;  %v1913_v18 = vadd.f32 %v1827_v47, %v1534_v41  ;;  %v1914_v17 = vadd.f32 %v1829_v21, %v1535_v49  ;;  %v2480_v54 = vpop.f32.mrf.mxu1  ;;  %v2528_v10 = vpop.f32.mrf.mxu0  ;;  %v1832_v28 = vrot.slane %v1681_v59, 4 }
 0x16a   :  { %v1987_v24 = vmax.f32 %v1955_v45, 0.0  ;;  %v1458_v56 = vrot.slane %v2480_v54, 3  ;;  %v1837_v26 = vrot.slane %v2528_v10, 4 }
 0x16b   :  { %v1952_v60 = vadd.f32 %v3041_v34, %v1913_v18  ;;  %v1953_v19 = vadd.f32 %v3041_v34, %v1914_v17  ;;  %v1305_v30 = vpop.f32.mrf.mxu1  ;;  %v1684_v32 = vpop.f32.mrf.mxu0  ;;  %v1986_v2 = vmax.f32 %v1954_v48, 0.0 }
 0x16c   :  { %v2018_v1 = vsel %vm1824_vm3, %v1987_v24, -inf  ;;  %v1459_v58 = vsel %vm1445_vm2, %v1456_v52, %v1458_v56  ;;  %v1541_v11 = vadd.f32 %v1458_v56, %v2913_v40  ;;  %v1454_v57 = vrot.slane %v1305_v30, 3 }
 0x16d   :  { %v1984_v15 = vmax.f32 %v1952_v60, 0.0  ;;  %v1985_v35 = vmax.f32 %v1953_v19, 0.0  ;;  %v1540_v36 = vadd.f32 %v1459_v58, %v2917_v43  ;;  %v2483_v3 = vpop.f32.mrf.mxu1  ;;  %v3058_v39 = vpop.f32.mrf.mxu0  ;;  %v1838_v7 = vsel %vm1824_vm3, %v1835_v9, %v1837_v26 }
 0x16e   :  { %v1920_v46 = vadd.f32 %v1837_v26, %v1541_v11  ;;  %v1833_v41 = vrot.slane %v1684_v32, 4  ;;  %v1463_v49 = vrot.slane %v2483_v3, 3  ;;  %v1455_v45 = vsel %vm1445_vm2, %v1453_v23, %v1454_v57 }
 0x16f   :  { %v2016_v42 = vmax.f32 %v1984_v15, %v1985_v35  ;;  %v1919_v59 = vadd.f32 %v1838_v7, %v1540_v36  ;;  %v1457_v47 = vsel %vm1445_vm2, %v1454_v57, %v1456_v52  ;;  %v1318_v40 = vpop.f32.mrf.mxu1  ;;  %v1697_v21 = vpop.f32.mrf.mxu0  ;;  %v1538_v43 = vadd.f32 %v1455_v45, %v2923_v50 }
 0x170   :  { %v1959_v48 = vadd.f32 %v3041_v34, %v1920_v46  ;;  %v1539_v18 = vadd.f32 %v1457_v47, %v2925_v51  ;;  %v1842_v17 = vrot.slane %v3058_v39, 4  ;;  %v1834_v24 = vsel %vm1824_vm3, %v1832_v28, %v1833_v41 }
 0x171   :  { %v2017_v54 = vmax.f32 %v2016_v42, %v1986_v2  ;;  %v1958_v10 = vadd.f32 %v3041_v34, %v1919_v59  ;;  %v1836_v56 = vsel %vm1824_vm3, %v1833_v41, %v1835_v9  ;;  %v2484_v26 = vpop.f32.mrf.mxu1  ;;  %v2532_v60 = vpop.f32.mrf.mxu0  ;;  %v1917_v19 = vadd.f32 %v1834_v24, %v1538_v43 }
 0x172   :  { %v1991_v52 = vmax.f32 %v1959_v48, 0.0  ;;  %v1918_v23 = vadd.f32 %v1836_v56, %v1539_v18  ;;  %v1460_v30 = vrot.slane %v1318_v40, 3  ;;  %v1839_v58 = vrot.slane %v1697_v21, 4 }
 0x173   :  { %v2019_v32 = vmax.f32 %v2017_v54, %v2018_v1  ;;  %v1465_v50 = vrot.slane %v2484_v26, 3  ;;  %v1844_v11 = vrot.slane %v2532_v60, 4  ;;  %v1321_v51 = vpop.f32.mrf.mxu1  ;;  %v1700_v15 = vpop.f32.mrf.mxu0  ;;  %v1990_v35 = vmax.f32 %v1958_v10, 0.0 }
 0x174   :  { %v1956_v2 = vadd.f32 %v3041_v34, %v1917_v19  ;;  %v1957_v36 = vadd.f32 %v3041_v34, %v1918_v23  ;;  %v1461_v28 = vrot.slane %v1321_v51, 3  ;;  %v1840_v10 = vrot.slane %v1700_v15, 4 }
 0x175   :  { %v2020_v57 = vrot.slane %v2019_v32, 4  ;;  %v1466_v9 = vsel %vm1445_vm2, %v1463_v49, %v1465_v50  ;;  %v1545_v3 = vadd.f32 %v1465_v50, %v2931_v31  ;;  %v1845_v39 = vsel %vm1824_vm3, %v1842_v17, %v1844_v11  ;;  %v2487_v7 = vpop.f32.mrf.mxu1  ;;  %v3075_v1 = vpop.f32.mrf.mxu0 }
 0x176   :  { %v1988_v46 = vmax.f32 %v1956_v2, 0.0  ;;  %v1989_v41 = vmax.f32 %v1957_v36, 0.0  ;;  %v1544_v42 = vadd.f32 %v1466_v9, %v2935_v37  ;;  %v1462_v59 = vsel %vm1445_vm2, %v1460_v30, %v1461_v28 }
 0x177   :  { %v2021_v45 = vmax.f32 %v2019_v32, %v2020_v57  ;;  %v1924_v47 = vadd.f32 %v1844_v11, %v1545_v3  ;;  %v1464_v40 = vsel %vm1445_vm2, %v1461_v28, %v1463_v49  ;;  %v1542_v21 = vadd.f32 %v1462_v59, %v2941_v44  ;;  %v1334_v48 = vpop.f32.mrf.mxu1  ;;  %v1713_v43 = vpop.f32.mrf.mxu0 }
 0x178   :  { %v2026_v31 = vmax.f32 %v1988_v46, %v1989_v41  ;;  %v1923_v18 = vadd.f32 %v1845_v39, %v1544_v42  ;;  %v1543_v54 = vadd.f32 %v1464_v40, %v2943_v4  ;;  %v2028_v56 = vsel %vm1824_vm3, %v1991_v52, -inf }
 0x179   :  { %v2022_v24 = vrot.slane %v2021_v45, 2  ;;  %v1963_v37 = vadd.f32 %v3041_v34, %v1924_v47  ;;  %v1470_v26 = vrot.slane %v2487_v7, 3  ;;  %v2488_v60 = vpop.f32.mrf.mxu1  ;;  %v2536_v19 = vpop.f32.mrf.mxu0  ;;  %v1841_v44 = vsel %vm1824_vm3, %v1839_v58, %v1840_v10 }
 0x17a   :  { %v2027_v23 = vmax.f32 %v2026_v31, %v1990_v35  ;;  %v1962_v49 = vadd.f32 %v3041_v34, %v1923_v18  ;;  %v1843_v30 = vsel %vm1824_vm3, %v1840_v10, %v1842_v17  ;;  %v1921_v11 = vadd.f32 %v1841_v44, %v1542_v21 }
 0x17b   :  { %v2023_v32 = vmax.f32 %v2021_v45, %v2022_v24  ;;  %v1995_v50 = vmax.f32 %v1963_v37, 0.0  ;;  %v1922_v4 = vadd.f32 %v1843_v30, %v1543_v54  ;;  %v1337_v51 = vpop.f32.mrf.mxu1  ;;  %v1716_v15 = vpop.f32.mrf.mxu0  ;;  %v1849_v36 = vrot.slane %v3075_v1, 4 }
 0x17c   :  { %v2029_v2 = vmax.f32 %v2027_v23, %v2028_v56  ;;  %v1994_v52 = vmax.f32 %v1962_v49, 0.0  ;;  %v1467_v28 = vrot.slane %v1334_v48, 3  ;;  %v1960_v35 = vadd.f32 %v3041_v34, %v1921_v11 }
 0x17d   :  { %v2024_v57 = vrot.slane %v2023_v32, 1  ;;  %v1961_v9 = vadd.f32 %v3041_v34, %v1922_v4  ;;  %v1846_v3 = vrot.slane %v1713_v43, 4  ;;  %v3090_v58 = vpop.f32.mrf.mxu1  ;;  %v3092_v17 = vpop.f32.mrf.mxu0  ;;  %v1472_v7 = vrot.slane %v2488_v60, 3 }
 0x17e   :  { %v2030_v39 = vrot.slane %v2029_v2, 4  ;;  %v1851_v46 = vrot.slane %v2536_v19, 4  ;;  %v1468_v41 = vrot.slane %v1337_v51, 3  ;;  %v2038_v42 = vsel %vm1824_vm3, %v1995_v50, -inf }
 0x17f   :  { %v1992_v59 = vmax.f32 %v1960_v35, 0.0  ;;  %v1993_v45 = vmax.f32 %v1961_v9, 0.0  ;;  %v1847_v1 = vrot.slane %v1716_v15, 4  ;;  %v3095_v47 = vpop.f32.mrf.mxu1  ;;  %v3097_v40 = vpop.f32.mrf.mxu0  ;;  %v1473_v48 = vsel %vm1445_vm2, %v1470_v26, %v1472_v7 }
 0x180   :  { %v2031_v21 = vmax.f32 %v2029_v2, %v2030_v39  ;;  %v1549_v43 = vadd.f32 %v1472_v7, %v2949_v27  ;;  %v1852_v31 = vsel %vm1824_vm3, %v1849_v36, %v1851_v46  ;;  %v1548_v54 = vadd.f32 %v1473_v48, %v2953_v62 }
 0x181   :  { %v2036_v18 = vmax.f32 %v1992_v59, %v1993_v45  ;;  %v1469_v10 = vsel %vm1445_vm2, %v1467_v28, %v1468_v41  ;;  %v1471_v24 = vsel %vm1445_vm2, %v1468_v41, %v1470_v26  ;;  %v2492_v56 = vpop.f32.mrf.mxu1  ;;  %v2540_v37 = vpop.f32.mrf.mxu0  ;;  %v1848_v27 = vsel %vm1824_vm3, %v1846_v3, %v1847_v1 }
 0x182   :  { %v2032_v60 = vrot.slane %v2031_v21, 2  ;;  %v1928_v19 = vadd.f32 %v1851_v46, %v1549_v43  ;;  %v1546_v23 = vadd.f32 %v1469_v10, %v2959_v38  ;;  %v1547_v49 = vadd.f32 %v1471_v24, %v2961_v12 }
 0x183   :  { %v2037_v44 = vmax.f32 %v2036_v18, %v1994_v52  ;;  %v1927_v30 = vadd.f32 %v1852_v31, %v1548_v54  ;;  %v1850_v50 = vsel %vm1824_vm3, %v1847_v1, %v1849_v36  ;;  %v1353_v11 = vpop.f32.mrf.mxu1  ;;  %v1732_v62 = vpop.f32.mrf.mxu0  ;;  %v3115_v12 = vmax.f32 %v2023_v32, %v2024_v57 }
 0x184   :  { %v2033_v4 = vmax.f32 %v2031_v21, %v2032_v60  ;;  %v1967_v51 = vadd.f32 %v3041_v34, %v1928_v19  ;;  %v1925_v26 = vadd.f32 %v1848_v27, %v1546_v23  ;;  %v1926_v15 = vadd.f32 %v1850_v50, %v1547_v49 }
 0x185   :  { %v2039_v2 = vmax.f32 %v2037_v44, %v2038_v42  ;;  %v1966_v28 = vadd.f32 %v3041_v34, %v1927_v30  ;;  %v3111_v35 = vpop.f32.mrf.mxu1  ;;  %v3113_v38 = vpop.f32.mrf.mxu0  ;;  %v1477_v7 = vrot.slane %v3090_v58, 3  ;;  %v1856_v46 = vrot.slane %v3092_v17, 4 }
 0x186   :  { %v2034_v52 = vrot.slane %v2033_v4, 1  ;;  %v1964_v9 = vadd.f32 %v3041_v34, %v1925_v26  ;;  %v1965_v36 = vadd.f32 %v3041_v34, %v1926_v15  ;;  %v1999_v39 = vmax.f32 %v1967_v51, 0.0 }
 0x187   :  { %v2040_v3 = vrot.slane %v2039_v2, 4  ;;  %v3121_v41 = vpop.f32.mrf.mxu1  ;;  %v3123_v42 = vpop.f32.mrf.mxu0  ;;  %v1998_v59 = vmax.f32 %v1966_v28, 0.0  ;;  %v1474_v32 = vrot.slane %v3095_v47, 3  ;;  %v1479_v21 = vrot.slane %v2492_v56, 3 }
 0x188   :  { %v1996_v45 = vmax.f32 %v1964_v9, 0.0  ;;  %v1997_v1 = vmax.f32 %v1965_v36, 0.0  ;;  %v1858_v48 = vrot.slane %v2540_v37, 4  ;;  %v1475_v43 = vrot.slane %v1353_v11, 3 }
 0x189   :  { %v2041_v57 = vmax.f32 %v2039_v2, %v2040_v3  ;;  %v2496_v31 = vpop.f32.mrf.mxu1  ;;  %v2544_v18 = vpop.f32.mrf.mxu0  ;;  %v3126_v54 = vmax.f32 %v2033_v4, %v2034_v52  ;;  %v1853_v17 = vrot.slane %v3097_v40, 4  ;;  %v1854_v10 = vrot.slane %v1732_v62, 4 }
 0x18a   :  { %v2046_v58 = vmax.f32 %v1996_v45, %v1997_v1  ;;  %v2048_v60 = vsel %vm1824_vm3, %v1999_v39, -inf  ;;  %v1480_v19 = vsel %vm1445_vm2, %v1477_v7, %v1479_v21  ;;  %v1553_v23 = vadd.f32 %v1479_v21, %v2967_v55 }
 0x18b   :  { %v2042_v24 = vrot.slane %v2041_v57, 2  ;;  %v1369_v47 = vpop.f32.mrf.mxu1  ;;  %v3132_v49 = vpop.f32.mrf.mxu0  ;;  %v1552_v37 = vadd.f32 %v1480_v19, %v2971_v6  ;;  %v1476_v44 = vsel %vm1445_vm2, %v1474_v32, %v1475_v43  ;;  %v1478_v30 = vsel %vm1445_vm2, %v1475_v43, %v1477_v7 }
 0x18c   :  { %v2047_v56 = vmax.f32 %v2046_v58, %v1998_v59  ;;  %v1859_v40 = vsel %vm1824_vm3, %v1856_v46, %v1858_v48  ;;  %v1932_v27 = vadd.f32 %v1858_v48, %v1553_v23  ;;  %v1550_v50 = vadd.f32 %v1476_v44, %v2977_v33 }
 0x18d   :  { %v1551_v11 = vadd.f32 %v1478_v30, %v2979_v20  ;;  %v3140_v62 = vpop.f32.mrf.mxu1  ;;  %v3142_v55 = vpop.f32.mrf.mxu0  ;;  %v1931_v51 = vadd.f32 %v1859_v40, %v1552_v37  ;;  %v1855_v26 = vsel %vm1824_vm3, %v1853_v17, %v1854_v10  ;;  %v1857_v6 = vsel %vm1824_vm3, %v1854_v10, %v1856_v46 }
 0x18e   :  { %v2049_v4 = vmax.f32 %v2047_v56, %v2048_v60  ;;  %v1971_v15 = vadd.f32 %v3041_v34, %v1932_v27  ;;  %v1929_v2 = vadd.f32 %v1855_v26, %v1550_v50  ;;  %v1484_v52 = vrot.slane %v3111_v35, 3 }
 0x18f   :  { %v1930_v28 = vadd.f32 %v1857_v6, %v1551_v11  ;;  %v3148_v9 = vpop.f32.mrf.mxu1  ;;  %v3150_v33 = vpop.f32.mrf.mxu0  ;;  %v3152_v20 = vmax.f32 %v2041_v57, %v2042_v24  ;;  %v1863_v3 = vrot.slane %v3113_v38, 4  ;;  %v1486_v39 = vrot.slane %v2496_v31, 3 }
 0x190   :  { %v2050_v36 = vrot.slane %v2049_v4, 4  ;;  %v1970_v7 = vadd.f32 %v3041_v34, %v1931_v51  ;;  %v1968_v46 = vadd.f32 %v3041_v34, %v1929_v2  ;;  %v1865_v45 = vrot.slane %v2544_v18, 4 }
 0x191   :  { %v1969_v59 = vadd.f32 %v3041_v34, %v1930_v28  ;;  %v2500_v1 = vpop.f32.mrf.mxu1  ;;  %v2548_v32 = vpop.f32.mrf.mxu0  ;;  %v2003_v35 = vmax.f32 %v1971_v15, 0.0  ;;  %v1481_v21 = vrot.slane %v3121_v41, 3  ;;  %v1487_v48 = vsel %vm1445_vm2, %v1484_v52, %v1486_v39 }
 0x192   :  { %v1557_v57 = vadd.f32 %v1486_v39, %v2985_v0  ;;  %v2000_v43 = vmax.f32 %v1968_v46, 0.0  ;;  %v1860_v38 = vrot.slane %v3123_v42, 4  ;;  %v1556_v31 = vadd.f32 %v1487_v48, %v2989_v14 }
 0x193   :  { %v2001_v58 = vmax.f32 %v1969_v59, 0.0  ;;  %v1385_v17 = vpop.f32.mrf.mxu1  ;;  %v1764_v10 = vpop.f32.mrf.mxu0  ;;  %v3163_v24 = vmax.f32 %v2049_v4, %v2050_v36  ;;  %v1866_v18 = vsel %vm1824_vm3, %v1863_v3, %v1865_v45  ;;  %v1482_v19 = vrot.slane %v1369_v47, 3 }
 0x194   :  { %v1936_v60 = vadd.f32 %v1865_v45, %v1557_v57  ;;  %v2002_v23 = vmax.f32 %v1970_v7, 0.0  ;;  %v1935_v56 = vadd.f32 %v1866_v18, %v1556_v31  ;;  %v1861_v37 = vrot.slane %v3132_v49, 4 }
 0x195   :  { %v2056_v41 = vmax.f32 %v2000_v43, %v2001_v58  ;;  %v2058_v0 = vsel %vm1824_vm3, %v2003_v35, -inf  ;;  %v1483_v42 = vsel %vm1445_vm2, %v1481_v21, %v1482_v19  ;;  %v1485_v14 = vsel %vm1445_vm2, %v1482_v19, %v1484_v52  ;;  %v3174_v50 = vpop.f32.mrf.mxu1  ;;  %v3176_v11 = vpop.f32.mrf.mxu0 }
 0x196   :  { %v1975_v44 = vadd.f32 %v3041_v34, %v1936_v60  ;;  %v1974_v40 = vadd.f32 %v3041_v34, %v1935_v56  ;;  %v1554_v27 = vadd.f32 %v1483_v42, %v2995_v29  ;;  %v1555_v47 = vadd.f32 %v1485_v14, %v2997_v61 }
 0x197   :  { %v2057_v30 = vmax.f32 %v2056_v41, %v2002_v23  ;;  %v2052_v49 = vrot.slane %v3163_v24, 2  ;;  %v1862_v4 = vsel %vm1824_vm3, %v1860_v38, %v1861_v37  ;;  %v1864_v51 = vsel %vm1824_vm3, %v1861_v37, %v1863_v3  ;;  %v1398_v45 = vpop.f32.mrf.mxu1  ;;  %v3186_v3 = vpop.f32.mrf.mxu0 }
 0x198   :  { %v1491_v26 = vrot.slane %v3140_v62, 3  ;;  %v1933_v15 = vadd.f32 %v1862_v4, %v1554_v27  ;;  %v1934_v2 = vadd.f32 %v1864_v51, %v1555_v47  ;;  %v1870_v28 = vrot.slane %v3142_v55, 4 }
 0x199   :  { %v2059_v6 = vmax.f32 %v2057_v30, %v2058_v0  ;;  %v2007_v29 = vmax.f32 %v1975_v44, 0.0  ;;  %v1488_v61 = vrot.slane %v3148_v9, 3  ;;  %v1493_v52 = vrot.slane %v2500_v1, 3 }
 0x19a   :  { %v1872_v36 = vrot.slane %v2548_v32, 4  ;;  %v2006_v39 = vmax.f32 %v1974_v40, 0.0  ;;  %v1972_v7 = vadd.f32 %v3041_v34, %v1933_v15  ;;  %v1973_v46 = vadd.f32 %v3041_v34, %v1934_v2 }
 0x19b   :  { %v1489_v59 = vrot.slane %v1385_v17, 3  ;;  %v1867_v62 = vrot.slane %v3150_v33, 4  ;;  %v1494_v35 = vsel %vm1445_vm2, %v1491_v26, %v1493_v52  ;;  %v1561_v55 = vadd.f32 %v1493_v52, %v3003_v8  ;;  %v2504_v8 = vpop.f32.mrf.mxu1 }
 0x19c   :  { %v1868_v21 = vrot.slane %v1764_v10, 4  ;;  %v2060_v48 = vrot.slane %v2059_v6, 4  ;;  %v2004_v9 = vmax.f32 %v1972_v7, 0.0  ;;  %v2005_v1 = vmax.f32 %v1973_v46, 0.0  ;;  %v2552_v10 = vpop.f32.mrf.mxu0 }
 0x19d   :  { %v1560_v32 = vadd.f32 %v1494_v35, %v3007_v22  ;;  %v1873_v57 = vsel %vm1824_vm3, %v1870_v28, %v1872_v36  ;;  %v1940_v43 = vadd.f32 %v1872_v36, %v1561_v55  ;;  %v1490_v58 = vsel %vm1445_vm2, %v1488_v61, %v1489_v59  ;;  %v1401_v47 = vpop.f32.mrf.mxu1 }
 0x19e   :  { %v1492_v38 = vsel %vm1445_vm2, %v1489_v59, %v1491_v26  ;;  %v2066_v31 = vmax.f32 %v2004_v9, %v2005_v1  ;;  %v1558_v33 = vadd.f32 %v1490_v58, %v3013_v25  ;;  %v2068_v60 = vsel %vm1824_vm3, %v2007_v29, -inf  ;;  %v1780_v4 = vpop.f32.mrf.mxu0 }
 0x19f   :  { %v1939_v17 = vadd.f32 %v1873_v57, %v1560_v32  ;;  %v1559_v18 = vadd.f32 %v1492_v38, %v3015_v5  ;;  %v1979_v19 = vadd.f32 %v3041_v34, %v1940_v43  ;;  %v1869_v22 = vsel %vm1824_vm3, %v1867_v62, %v1868_v21 }
 0x1a0   :  { %v1871_v23 = vsel %vm1824_vm3, %v1868_v21, %v1870_v28  ;;  %v2061_v41 = vmax.f32 %v2059_v6, %v2060_v48  ;;  %v2067_v56 = vmax.f32 %v2066_v31, %v2006_v39  ;;  %v1937_v37 = vadd.f32 %v1869_v22, %v1558_v33 }
 0x1a1   :  { %v1938_v0 = vadd.f32 %v1871_v23, %v1559_v18  ;;  %v1978_v44 = vadd.f32 %v3041_v34, %v1939_v17  ;;  %v1498_v25 = vrot.slane %v3174_v50, 3  ;;  %v1877_v5 = vrot.slane %v3176_v11, 4 }
 0x1a2   :  { %v1500_v42 = vrot.slane %v2504_v8, 3  ;;  %v2069_v14 = vmax.f32 %v2067_v56, %v2068_v60  ;;  %v2011_v30 = vmax.f32 %v1979_v19, 0.0  ;;  %v1976_v40 = vadd.f32 %v3041_v34, %v1937_v37 }
 0x1a3   :  { %v1977_v27 = vadd.f32 %v3041_v34, %v1938_v0  ;;  %v1495_v51 = vrot.slane %v1398_v45, 3  ;;  %v1879_v15 = vrot.slane %v2552_v10, 4  ;;  %v1874_v2 = vrot.slane %v3186_v3, 4 }
 0x1a4   :  { %v1501_v26 = vsel %vm1445_vm2, %v1498_v25, %v1500_v42  ;;  %v1565_v6 = vadd.f32 %v1500_v42, %v3021_v16  ;;  %v2008_v50 = vmax.f32 %v1976_v40, 0.0  ;;  %v2010_v29 = vmax.f32 %v1978_v44, 0.0 }
 0x1a5   :  { %v2009_v11 = vmax.f32 %v1977_v27, 0.0  ;;  %v1564_v28 = vadd.f32 %v1501_v26, %v3025_v63  ;;  %v1880_v61 = vsel %vm1824_vm3, %v1877_v5, %v1879_v15  ;;  %v1496_v52 = vrot.slane %v1401_v47, 3 }
 0x1a6   :  { %v1875_v36 = vrot.slane %v1780_v4, 4  ;;  %v1944_v7 = vadd.f32 %v1879_v15, %v1565_v6  ;;  %v2044_v46 = vrot.slane %v3152_v20, 1  ;;  %v2053_v16 = vmax.f32 %v3163_v24, %v2052_v49 }
 0x1a7   :  { %v2076_v39 = vmax.f32 %v2008_v50, %v2009_v11  ;;  %v2070_v59 = vrot.slane %v2069_v14, 4  ;;  %v1943_v45 = vadd.f32 %v1880_v61, %v1564_v28  ;;  %v1497_v62 = vsel %vm1445_vm2, %v1495_v51, %v1496_v52 }
 0x1a8   :  { %v1499_v3 = vsel %vm1445_vm2, %v1496_v52, %v1498_v25  ;;  %v2078_v63 = vsel %vm1824_vm3, %v2011_v30, -inf  ;;  %v1562_v55 = vadd.f32 %v1497_v62, %v3031_v53  ;;  %v1876_v48 = vsel %vm1824_vm3, %v1874_v2, %v1875_v36 }
 0x1a9   :  { %v2077_v35 = vmax.f32 %v2076_v39, %v2010_v29  ;;  %v1563_v21 = vadd.f32 %v1499_v3, %v3033_v13  ;;  %v1878_v9 = vsel %vm1824_vm3, %v1875_v36, %v1877_v5  ;;  %v2045_v1 = vmax.f32 %v3152_v20, %v2044_v46 }
 0x1aa   :  { %v2054_v24 = vrot.slane %v2053_v16, 1  ;;  %v1983_v32 = vadd.f32 %v3041_v34, %v1944_v7  ;;  %v1941_v57 = vadd.f32 %v1876_v48, %v1562_v55  ;;  %v1982_v58 = vadd.f32 %v3041_v34, %v1943_v45 }
 0x1ab   :  { %v2079_v49 = vmax.f32 %v2077_v35, %v2078_v63  ;;  %v1942_v43 = vadd.f32 %v1878_v9, %v1563_v21  ;;  %v2062_v31 = vrot.slane %v2061_v41, 2  ;;  %v2071_v17 = vmax.f32 %v2069_v14, %v2070_v59 }
 0x1ac   :  { %v2055_v38 = vmax.f32 %v2053_v16, %v2054_v24  ;;  %v1980_v53 = vadd.f32 %v3041_v34, %v1941_v57  ;;  %v2105_v20 = vsel %vm2104_vm4, %v3126_v54, %v3115_v12  ;;  %v2015_v56 = vmax.f32 %v1983_v32, 0.0 }
 0x1ad   :  { %v1981_v13 = vadd.f32 %v3041_v34, %v1942_v43  ;;  %v2080_v33 = vrot.slane %v2079_v49, 4  ;;  %v2063_v18 = vmax.f32 %v2061_v41, %v2062_v31  ;;  %v2072_v8 = vrot.slane %v2071_v17, 2 }
 0x1ae   :  { %v2107_v10 = vsel %vm2106_vm5, %v2045_v1, %v2105_v20  ;;  %v2012_v60 = vmax.f32 %v1980_v53, 0.0  ;;  %v2014_v44 = vmax.f32 %v1982_v58, 0.0  ;;  %v2088_v54 = vsel %vm1824_vm3, %v2015_v56, -inf }
 0x1af   :  { %v2013_v19 = vmax.f32 %v1981_v13, 0.0  ;;  %v2081_v22 = vmax.f32 %v2079_v49, %v2080_v33  ;;  %v2109_v23 = vsel %vm2108_vm6, %v2055_v38, %v2107_v10  ;;  %v2064_v37 = vrot.slane %v2063_v18, 1 }
 0x1b0   :  { %v2073_v0 = vmax.f32 %v2071_v17, %v2072_v8 }
 0x1b1   :  { %v2086_v25 = vmax.f32 %v2012_v60, %v2013_v19  ;;  %v2082_v34 = vrot.slane %v2081_v22, 2  ;;  %v2065_v5 = vmax.f32 %v2063_v18, %v2064_v37 }
 0x1b2   :  { %v2074_v42 = vrot.slane %v2073_v0, 1 }
 0x1b3   :  { %v2087_v14 = vmax.f32 %v2086_v25, %v2014_v44  ;;  %v2083_v12 = vmax.f32 %v2081_v22, %v2082_v34  ;;  %v2111_v30 = vsel %vm2110_vm7, %v2065_v5, %v2109_v23 }
 0x1b4   :  { %v2075_v41 = vmax.f32 %v2073_v0, %v2074_v42 }
 0x1b5   :  { %v2084_v40 = vrot.slane %v2083_v12, 1  ;;  %v2089_v27 = vmax.f32 %v2087_v14, %v2088_v54 }
 0x1b6   :  { %v2113_v47 = vsel %vm2112_vm8, %v2075_v41, %v2111_v30 }
 0x1b7   :  { %v2085_v4 = vmax.f32 %v2083_v12, %v2084_v40  ;;  %v2090_v51 = vrot.slane %v2089_v27, 4 }
 0x1b9   :  { %v2091_v26 = vmax.f32 %v2089_v27, %v2090_v51  ;;  %v2115_v6 = vsel %vm2114_vm9, %v2085_v4, %v2113_v47 }
 0x1bb   :  { %v2092_v15 = vrot.slane %v2091_v26, 2 }
 0x1bd   :  { %v2093_v50 = vmax.f32 %v2091_v26, %v2092_v15 }
 0x1bf   :  { %v2094_v11 = vrot.slane %v2093_v50, 1 }
 0x1c1   :  { %v2095_v2 = vmax.f32 %v2093_v50, %v2094_v11 }
 0x1c3   :  { %v2117_v28 = vsel %vm2116_vm10, %v2095_v2, %v2115_v6 }
 0x1c4   :  { %2119 = vst [vmem:[#allocation7] sm:$0xff] %v2117_v28 }
 0x1c5   :  { %2681 = shalt.err (!%p2678_p0)
}
 0x1c6   :  { %2129 = dma.vmem_to_hbm [thread:$0]  %s2127_s24, 128, %s3239_s3, [#allocation4]  }
 0x1c7   :  { %2694 = dma.done.wait [#allocation4], 128  }
 0x1c8   :  { %2695 = vsyncadd [#allocation4], 4294967168 }
 0x1c9   :  { %2133 = vsyncpa [#allocation3], 1 }
 0x1ca   :  { %2134 = vsyncpa [#allocation6], 1 }
 0x1cb   :  { %2135 = vsyncpa [#allocation4], 1 }

</bundles_post_ra>
